<compile_context>
chip_gen: v7x
topology: tpu7x:2x2x1
jax: 0.10.0
libtpu: 0.0.40
codegen_flags: <defaults>
</compile_context>

<pallas_src>
import math

import jax
import jax.numpy as jnp
from jax.experimental import pallas as pl
from jax.experimental.pallas import tpu as pltpu


# --------------------------------- helpers -----------------------------------

def _round_up(x, m):
    return ((x + m - 1) // m) * m


def _pick_candidate_block(N, D, H, esize):
    """Largest 128-multiple candidate row block whose working set (input block,
    gates, h/c temporaries, 2x buffering headroom) stays well inside the v7x
    64 MiB/TC VMEM budget (also fine for v5e/v6e)."""
    need = _round_up(max(N, 1), 128)
    for blk in (512, 256, 128):
        live = blk * (2 * D * esize + 12 * H * 4)
        if blk <= need and live <= 24 * (1 << 20):
            return blk
    return 128


# ------------------------ candidate-path + score kernel -----------------------

def _make_candidate_kernel(H, L, compute_dtype):
    """T==1 stacked BiLSTM over a block of candidate rows + dense/sparse score.

    Fused gate columns: [i_f i_b | o_f o_b | g_f g_b | f_f f_b].  With c0 = 0
    the f gate is never needed, so only 6H of the 8H gate lanes hit the EUP.
    """
    H2, H4, H6 = 2 * H, 4 * H, 6 * H
    cdt = compute_dtype

    def kernel(*refs):
        cand_ref, qout_ref, sp_ref, sw_ref = refs[:4]
        w_refs = refs[4:4 + 2 * L]
        out_ref = refs[4 + 2 * L]

        z = cand_ref[0]                                        # (blk, D), compute dtype
        for l in range(L):
            wih = w_refs[2 * l][...]                           # (Din_l, 8H), compute dtype
            b = w_refs[2 * l + 1][...]                         # (1, 8H), f32
            gates = jnp.dot(z, wih, preferred_element_type=jnp.float32) + b
            sig = jax.nn.sigmoid(gates[:, :H4])                # [i_f i_b | o_f o_b]
            g = jnp.tanh(gates[:, H4:H6])                      # [g_f g_b]
            c = sig[:, :H2] * g                                # c = i*g       (c0 = 0)
            h = sig[:, H2:H4] * jnp.tanh(c)                    # h = o*tanh(c) = [h_f|h_b]
            z = h.astype(cdt)

        # dense score on the MXU: (Tq, 2H) . (blk, 2H)^T -> (Tq, blk) (lane-dense)
        q_b = qout_ref[0].astype(cdt)                          # (Tq, 2H)
        dense = jax.lax.dot_general(q_b, z, (((1,), (1,)), ((), ())),
                                    preferred_element_type=jnp.float32)
        out_ref[0] = dense + sp_ref[0] * sw_ref[0, 0]          # sparse term hoisted

    return kernel


# ------------------------------ query-path kernel ------------------------------

def _make_query_kernel(B, Tq, H, L, compute_dtype):
    """Stacked bidirectional LSTM over the (tiny) query sequence, run once.

    Uses the same fused gate layout as the candidate kernel.  The forward and
    backward recurrences are fused into one loop: at step t the forward cell
    consumes timestep t and the backward cell timestep Tq-1-t, selected with a
    lane mask, and the single (B,2H)x(2H,8H) recurrent matmul uses a
    block-structured weight so the directions never mix.
    """
    H2, H4, H6, H8 = 2 * H, 4 * H, 6 * H, 8 * H
    cdt = compute_dtype

    def kernel(*refs):
        x_ref = refs[0]
        w_refs = refs[1:1 + 3 * L]
        out_ref = refs[1 + 3 * L]

        if Tq > 1:
            col = jax.lax.broadcasted_iota(jnp.int32, (1, H8), 1)
            fwd_cols = ((col // H) % 2) == 0                   # H-wide fwd/bwd groups

        xs = x_ref[...]                                        # (Tq*B, Din), time-major
        for l in range(L):
            wih_ref, whh_ref, b_ref = w_refs[3 * l:3 * l + 3]
            b = b_ref[...]
            # batched input projection: ONE GEMM over all Tq timesteps
            gpre = jnp.dot(xs, wih_ref[...], preferred_element_type=jnp.float32) + b

            hcat = None                                        # (B, 2H) = [h_f | h_b]
            ccat = None
            hf = [None] * Tq
            hb = [None] * Tq
            for t in range(Tq):
                g_t = gpre[t * B:(t + 1) * B, :]
                if Tq > 1:
                    g_rev = gpre[(Tq - 1 - t) * B:(Tq - t) * B, :]
                    g_t = jnp.where(fwd_cols, g_t, g_rev)
                if hcat is not None:                           # h0 = 0: skip at t == 0
                    g_t = g_t + jnp.dot(hcat.astype(cdt), whh_ref[...],
                                        preferred_element_type=jnp.float32)
                sig = jax.nn.sigmoid(g_t[:, :H4])              # [i_f i_b | o_f o_b]
                gg = jnp.tanh(g_t[:, H4:H6])                   # [g_f g_b]
                if ccat is None:                               # c0 = 0: skip f*c
                    ccat = sig[:, :H2] * gg
                else:
                    ccat = jax.nn.sigmoid(g_t[:, H6:H8]) * ccat + sig[:, :H2] * gg
                hcat = sig[:, H2:H4] * jnp.tanh(ccat)          # [h_f(t) | h_b(Tq-1-t)]
                hf[t] = hcat[:, :H]
                hb[Tq - 1 - t] = hcat[:, H:H2]

            if Tq == 1:
                h_ts = [hcat]                                  # already [h_f | h_b]
            else:
                h_ts = [jnp.concatenate([hf[t], hb[t]], axis=-1) for t in range(Tq)]

            if l == L - 1:
                for t in range(Tq):
                    out_ref[:, t, :] = h_ts[t]
            else:
                xs = (h_ts[0] if Tq == 1
                      else jnp.concatenate(h_ts, axis=0)).astype(cdt)

    return kernel


# ------------------------------- module forward --------------------------------

def bilstm_bne_forward(params, sparse_weight,
                       query_dense_embeddings, candidate_dense_embedding,
                       candidate_sparse_score, *, compute_dtype=jnp.float32):
    """BiLSTM_BNE.forward. Returns (score, query_emb, candidate_emb)."""
    B, Tq, D = query_dense_embeddings.shape
    _, N, _ = candidate_dense_embedding.shape
    H = params[0]['whh'].shape[0] // 2
    L = len(params)
    H2, H8 = 2 * H, 8 * H
    cdt = jnp.dtype(compute_dtype)

    vmem = pl.BlockSpec(memory_space=pltpu.MemorySpace.VMEM)
    smem = pl.BlockSpec(memory_space=pltpu.MemorySpace.SMEM)

    # ---- (1) query path: one small gridless kernel, runs the BiLSTM once ------
    qx = jnp.transpose(query_dense_embeddings, (1, 0, 2)).reshape(Tq * B, D).astype(cdt)
    q_weights = []
    for lp in params:
        q_weights += [lp['wih'].astype(cdt), lp['whh'].astype(cdt), lp['b']]
    q_out = pl.pallas_call(
        _make_query_kernel(B, Tq, H, L, cdt),
        out_shape=jax.ShapeDtypeStruct((B, Tq, H2), jnp.float32),
        in_specs=[vmem] * (1 + 3 * L),
        out_specs=vmem,
    )(qx, *q_weights)

    # ---- (2) candidate path + score: grid over (batch, candidate row blocks) --
    blk = _pick_candidate_block(N, D, H, cdt.itemsize)
    N_pad = _round_up(N, blk)                                  # lane-dense output
    cand = jnp.zeros((B, N_pad, D), cdt).at[:, :N, :].set(
        candidate_dense_embedding.astype(cdt))
    sp = jnp.zeros((B, 1, N_pad), jnp.float32).at[:, 0, :N].set(
        candidate_sparse_score.astype(jnp.float32))
    sw = jnp.asarray(sparse_weight, jnp.float32).reshape(1, 1)

    c_weights, c_wspecs = [], []
    for lp in params:
        c_weights += [lp['wih'].astype(cdt), lp['b']]
        c_wspecs += [pl.BlockSpec(lp['wih'].shape, lambda b, j: (0, 0)),   # resident
                     pl.BlockSpec((1, H8), lambda b, j: (0, 0))]

    score_padded = pl.pallas_call(
        _make_candidate_kernel(H, L, cdt),
        out_shape=jax.ShapeDtypeStruct((B, Tq, N_pad), jnp.float32),
        grid=(B, N_pad // blk),
        in_specs=[pl.BlockSpec((1, blk, D), lambda b, j: (b, j, 0)),   # candidates
                  pl.BlockSpec((1, Tq, H2), lambda b, j: (b, 0, 0)),   # query outputs
                  pl.BlockSpec((1, 1, blk), lambda b, j: (b, 0, j)),   # sparse scores
                  smem] + c_wspecs,                                    # sparse_weight
        out_specs=pl.BlockSpec((1, Tq, blk), lambda b, j: (b, 0, j)),
        compiler_params=pltpu.CompilerParams(
            dimension_semantics=("parallel", "parallel"),
            vmem_limit_bytes=32 * 1024 * 1024),
    )(cand, q_out, sp, sw, *c_weights)

    score = score_padded[:, :, :N]
    if Tq == 1:
        score = score[:, 0, :]
    return score, query_dense_embeddings, candidate_dense_embedding


# ------------------------------- parameter init --------------------------------

def init_bilstm_params(key, input_size, hidden_size, num_layers):
    """Deterministic init mimicking torch.nn.LSTM's U(-1/sqrt(H), 1/sqrt(H)).

    Stores the fused, direction-interleaved layout used by the kernels
    ('wih'/'b' columns [i_f i_b | o_f o_b | g_f g_b | f_f f_b] and a
    block-structured (2H, 8H) 'whh') plus plain per-direction arrays
    ('ref_*', torch gate order i,f,g,o) for the pure-JAX reference.
    """
    H = hidden_size
    stdv = 1.0 / math.sqrt(H)
    gate_order = (0, 3, 2, 1)                     # fused groups [i, o, g, f]
    params = []
    for layer in range(num_layers):
        din = input_size if layer == 0 else 2 * H
        lp, per_dir = {}, {}
        for tag in ('f', 'b'):
            key, k1, k2, k3, k4 = jax.random.split(key, 5)
            w_ih = jax.random.uniform(k1, (4 * H, din), jnp.float32, -stdv, stdv)
            w_hh = jax.random.uniform(k2, (4 * H, H), jnp.float32, -stdv, stdv)
            b_ih = jax.random.uniform(k3, (4 * H,), jnp.float32, -stdv, stdv)
            b_hh = jax.random.uniform(k4, (4 * H,), jnp.float32, -stdv, stdv)
            lp['ref_wih_' + tag] = w_ih.T                        # (din, 4H) [i|f|g|o]
            lp['ref_whh_' + tag] = w_hh.T                        # (H, 4H)
            lp['ref_b_' + tag] = (b_ih + b_hh).reshape(1, 4 * H)
            per_dir[tag] = (w_ih.T, w_hh.T, b_ih + b_hh)
        wih_cols, b_cols = [], []
        whh_fused = jnp.zeros((2 * H, 8 * H), jnp.float32)
        for k, gi in enumerate(gate_order):
            for d, tag in enumerate(('f', 'b')):
                wih_t, whh_t, bsum = per_dir[tag]
                wih_cols.append(wih_t[:, gi * H:(gi + 1) * H])
                b_cols.append(bsum[gi * H:(gi + 1) * H])
                whh_fused = whh_fused.at[
                    d * H:(d + 1) * H, (2 * k + d) * H:(2 * k + d + 1) * H].set(
                        whh_t[:, gi * H:(gi + 1) * H])
        lp['wih'] = jnp.concatenate(wih_cols, axis=1)            # (din, 8H)
        lp['b'] = jnp.concatenate(b_cols).reshape(1, 8 * H)      # (1, 8H)
        lp['whh'] = whh_fused                                    # (2H, 8H)
        params.append(lp)
    return params


# ------------------------- pure-JAX reference (check) ---------------------------

def reference_forward(params, sparse_weight, query, cand, sparse):
    """Plain-JAX re-implementation of BiLSTM_BNE.forward (no Pallas)."""
    H = params[0]['ref_whh_f'].shape[0]
    hi = jax.lax.Precision.HIGHEST

    def mmr(a, b):
        return jnp.dot(a, b, precision=hi)

    def run_dir(xs, wih, whh, b):
        M = xs[0].shape[0]
        h = jnp.zeros((M, H), jnp.float32)
        c = jnp.zeros((M, H), jnp.float32)
        out = []
        for x in xs:
            gates = mmr(x, wih) + mmr(h, whh) + b
            i = jax.nn.sigmoid(gates[:, 0:H])
            f = jax.nn.sigmoid(gates[:, H:2 * H])
            g = jnp.tanh(gates[:, 2 * H:3 * H])
            o = jax.nn.sigmoid(gates[:, 3 * H:4 * H])
            c = f * c + i * g
            h = o * jnp.tanh(c)
            out.append(h)
        return out

    def bilstm(x_btd):
        xs = [x_btd[:, t, :].astype(jnp.float32) for t in range(x_btd.shape[1])]
        for lp in params:
            hf = run_dir(xs, lp['ref_wih_f'], lp['ref_whh_f'], lp['ref_b_f'])
            hb = run_dir(xs[::-1], lp['ref_wih_b'], lp['ref_whh_b'], lp['ref_b_b'])[::-1]
            xs = [jnp.concatenate([hf[t], hb[t]], axis=-1) for t in range(len(xs))]
        return jnp.stack(xs, axis=1)

    q_out = bilstm(query)                                       # (B, Tq, 2H)
    B, N, D = cand.shape
    c_out = bilstm(cand.reshape(B * N, 1, D)).reshape(B, N, 2 * H)
    dense = jnp.einsum('btd,bnd->btn', q_out, c_out, precision=hi)
    score = dense + sparse[:, None, :] * jnp.asarray(sparse_weight, jnp.float32)
    return score[:, 0, :] if query.shape[1] == 1 else score


# ------------------------------------ main --------------------------------------

if __name__ == "__main__":
    input_size, hidden_size, num_layers = 16, 32, 2
    B, N_cand = 2, 8

    key = jax.random.PRNGKey(0)
    kq, kc, ks, kp, kq2 = jax.random.split(key, 5)
    params = init_bilstm_params(kp, input_size, hidden_size, num_layers)
    sparse_weight = jnp.ones((), jnp.float32)          # initial_sparse_weight = 1.0
    cand = jax.random.normal(kc, (B, N_cand, input_size), jnp.float32)
    sparse = jax.random.normal(ks, (B, N_cand), jnp.float32)

    fwd = jax.jit(bilstm_bne_forward, static_argnames=("compute_dtype",))

    # --- T_q == 1 (the reference's .squeeze() case), f32 compute, tight check ---
    query1 = jax.random.normal(kq, (B, 1, input_size), jnp.float32)
    score1, q_ret, c_ret = fwd(params, sparse_weight, query1, cand, sparse)
    jax.block_until_ready((score1, q_ret, c_ret))
    assert score1.shape == (B, N_cand)
    ref1 = reference_forward(params, sparse_weight, query1, cand, sparse)
    assert jnp.allclose(score1, ref1, atol=2e-4, rtol=2e-4), "Tq=1 f32 mismatch"

    # --- T_q > 1 path (sequence query), f32 compute ------------------------------
    query8 = jax.random.normal(kq2, (B, 8, input_size), jnp.float32)
    score8, _, _ = fwd(params, sparse_weight, query8, cand, sparse)
    jax.block_until_ready(score8)
    assert score8.shape == (B, 8, N_cand)
    ref8 = reference_forward(params, sparse_weight, query8, cand, sparse)
    assert jnp.allclose(score8, ref8, atol=2e-4, rtol=2e-4), "Tq=8 f32 mismatch"

    # --- bf16 MXU-operand variant (f32 accumulation / gate math), loose check ---
    score_bf16, _, _ = fwd(params, sparse_weight, query1, cand, sparse,
                           compute_dtype=jnp.bfloat16)
    jax.block_until_ready(score_bf16)
    assert jnp.allclose(score_bf16, ref1, atol=5e-2, rtol=5e-2), "bf16 mismatch"

    print("KERNEL_OK")
</pallas_src>

<mosaic_0001>
module attributes {stable_mosaic.version = 11 : i64} {
  func.func @kernel(%arg0: memref<2x16xf32, #tpu.memory_space<vmem>>, %arg1: memref<16x256xf32, #tpu.memory_space<vmem>>, %arg2: memref<64x256xf32, #tpu.memory_space<vmem>>, %arg3: memref<1x256xf32, #tpu.memory_space<vmem>>, %arg4: memref<64x256xf32, #tpu.memory_space<vmem>>, %arg5: memref<64x256xf32, #tpu.memory_space<vmem>>, %arg6: memref<1x256xf32, #tpu.memory_space<vmem>>, %arg7: memref<2x1x64xf32, #tpu.memory_space<vmem>>) attributes {dimension_semantics = [], scalar_prefetch = 0 : i64, scratch_operands = 0 : i64, tpu.core_type = #tpu.core_type<tc>} {
    %c0 = arith.constant 0 : index
    %c0_0 = arith.constant 0 : index
    %0 = vector.load %arg0[%c0, %c0_0] : memref<2x16xf32, #tpu.memory_space<vmem>>, vector<2x16xf32>
    %c0_1 = arith.constant 0 : index
    %c0_2 = arith.constant 0 : index
    %1 = vector.load %arg3[%c0_1, %c0_2] : memref<1x256xf32, #tpu.memory_space<vmem>>, vector<1x256xf32>
    %c0_3 = arith.constant 0 : index
    %c0_4 = arith.constant 0 : index
    %2 = vector.load %arg1[%c0_3, %c0_4] : memref<16x256xf32, #tpu.memory_space<vmem>>, vector<16x256xf32>
    %cst = arith.constant dense<0.000000e+00> : vector<2x256xf32>
    %3 = tpu.matmul %0, %2, %cst {dimension_numbers = #tpu.dot_dimension_numbers<[1], [0], [0], [1], [0, 0, 1, 1], [], []>} : vector<2x16xf32>, vector<16x256xf32>, vector<2x256xf32> -> vector<2x256xf32>
    %4 = vector.broadcast %1 : vector<1x256xf32> to vector<2x256xf32>
    %5 = arith.addf %3, %4 : vector<2x256xf32>
    %6 = vector.extract_strided_slice %5 {offsets = [0, 0], sizes = [2, 128], strides = [1, 1]} : vector<2x256xf32> to vector<2x128xf32>
    %7 = arith.negf %6 : vector<2x128xf32>
    %8 = math.exp %7 : vector<2x128xf32>
    %cst_5 = arith.constant 1.000000e+00 : f32
    %9 = vector.broadcast %cst_5 : f32 to vector<2x128xf32>
    %10 = arith.addf %9, %8 : vector<2x128xf32>
    %11 = arith.divf %9, %10 : vector<2x128xf32>
    %12 = vector.extract_strided_slice %5 {offsets = [0, 128], sizes = [2, 64], strides = [1, 1]} : vector<2x256xf32> to vector<2x64xf32>
    %13 = math.tanh %12 : vector<2x64xf32>
    %14 = vector.extract_strided_slice %11 {offsets = [0, 0], sizes = [2, 64], strides = [1, 1]} : vector<2x128xf32> to vector<2x64xf32>
    %15 = arith.mulf %14, %13 : vector<2x64xf32>
    %16 = vector.extract_strided_slice %11 {offsets = [0, 64], sizes = [2, 64], strides = [1, 1]} : vector<2x128xf32> to vector<2x64xf32>
    %17 = math.tanh %15 : vector<2x64xf32>
    %18 = arith.mulf %16, %17 : vector<2x64xf32>
    %c0_6 = arith.constant 0 : index
    %c0_7 = arith.constant 0 : index
    %19 = vector.load %arg6[%c0_6, %c0_7] : memref<1x256xf32, #tpu.memory_space<vmem>>, vector<1x256xf32>
    %c0_8 = arith.constant 0 : index
    %c0_9 = arith.constant 0 : index
    %20 = vector.load %arg4[%c0_8, %c0_9] : memref<64x256xf32, #tpu.memory_space<vmem>>, vector<64x256xf32>
    %cst_10 = arith.constant dense<0.000000e+00> : vector<2x256xf32>
    %21 = tpu.matmul %18, %20, %cst_10 {dimension_numbers = #tpu.dot_dimension_numbers<[1], [0], [0], [1], [0, 0, 1, 1], [], []>} : vector<2x64xf32>, vector<64x256xf32>, vector<2x256xf32> -> vector<2x256xf32>
    %22 = vector.broadcast %19 : vector<1x256xf32> to vector<2x256xf32>
    %23 = arith.addf %21, %22 : vector<2x256xf32>
    %24 = vector.extract_strided_slice %23 {offsets = [0, 0], sizes = [2, 128], strides = [1, 1]} : vector<2x256xf32> to vector<2x128xf32>
    %25 = arith.negf %24 : vector<2x128xf32>
    %26 = math.exp %25 : vector<2x128xf32>
    %cst_11 = arith.constant 1.000000e+00 : f32
    %27 = vector.broadcast %cst_11 : f32 to vector<2x128xf32>
    %28 = arith.addf %27, %26 : vector<2x128xf32>
    %29 = arith.divf %27, %28 : vector<2x128xf32>
    %30 = vector.extract_strided_slice %23 {offsets = [0, 128], sizes = [2, 64], strides = [1, 1]} : vector<2x256xf32> to vector<2x64xf32>
    %31 = math.tanh %30 : vector<2x64xf32>
    %32 = vector.extract_strided_slice %29 {offsets = [0, 0], sizes = [2, 64], strides = [1, 1]} : vector<2x128xf32> to vector<2x64xf32>
    %33 = arith.mulf %32, %31 : vector<2x64xf32>
    %34 = vector.extract_strided_slice %29 {offsets = [0, 64], sizes = [2, 64], strides = [1, 1]} : vector<2x128xf32> to vector<2x64xf32>
    %35 = math.tanh %33 : vector<2x64xf32>
    %36 = arith.mulf %34, %35 : vector<2x64xf32>
    %c0_12 = arith.constant 0 : index
    %c0_13 = arith.constant 0 : index
    %c0_14 = arith.constant 0 : index
    %37 = vector.load %arg7[%c0_12, %c0_13, %c0_14] : memref<2x1x64xf32, #tpu.memory_space<vmem>>, vector<2x1x64xf32>
    %38 = vector.shape_cast %37 : vector<2x1x64xf32> to vector<2x64xf32>
    %39 = vector.shape_cast %36 : vector<2x64xf32> to vector<2x1x64xf32>
    tpu.vector_store %arg7[%c0_12, %c0_13, %c0_14], %39 {strides = array<i32>} : memref<2x1x64xf32, #tpu.memory_space<vmem>>, vector<2x1x64xf32>,
    return
  }
}

module attributes {stable_mosaic.version = 11 : i64} {
  func.func @kernel(%arg0: i32, %arg1: i32, %arg2: memref<1x128x16xf32, #tpu.memory_space<vmem>>, %arg3: memref<1x1x64xf32, #tpu.memory_space<vmem>>, %arg4: memref<1x1x128xf32, #tpu.memory_space<vmem>>, %arg5: memref<1x1xf32, #tpu.memory_space<smem>>, %arg6: memref<16x256xf32, #tpu.memory_space<vmem>>, %arg7: memref<1x256xf32, #tpu.memory_space<vmem>>, %arg8: memref<64x256xf32, #tpu.memory_space<vmem>>, %arg9: memref<1x256xf32, #tpu.memory_space<vmem>>, %arg10: memref<1x1x128xf32, #tpu.memory_space<vmem>>) attributes {dimension_semantics = [#tpu.dimension_semantics<parallel>, #tpu.dimension_semantics<parallel>], iteration_bounds = array<i64: 2, 1>, scalar_prefetch = 0 : i64, scratch_operands = 0 : i64, tpu.core_type = #tpu.core_type<tc>, window_params = [{transform_indices = @transform_0, window_bounds = array<i64: 1, 128, 16>}, {transform_indices = @transform_1, window_bounds = array<i64: 1, 1, 64>}, {transform_indices = @transform_2, window_bounds = array<i64: 1, 1, 128>}, {transform_indices = @transform_3, window_bounds = array<i64: 1, 1>}, {pipeline_mode = #tpu.pipeline_mode<synchronous>, transform_indices = @transform_4, window_bounds = array<i64: 16, 256>}, {pipeline_mode = #tpu.pipeline_mode<synchronous>, transform_indices = @transform_5, window_bounds = array<i64: 1, 256>}, {pipeline_mode = #tpu.pipeline_mode<synchronous>, transform_indices = @transform_6, window_bounds = array<i64: 64, 256>}, {pipeline_mode = #tpu.pipeline_mode<synchronous>, transform_indices = @transform_7, window_bounds = array<i64: 1, 256>}, {transform_indices = @transform_8, window_bounds = array<i64: 1, 1, 128>}]} {
    %c0 = arith.constant 0 : index
    %c0_0 = arith.constant 0 : index
    %c0_1 = arith.constant 0 : index
    %0 = vector.load %arg2[%c0, %c0_0, %c0_1] : memref<1x128x16xf32, #tpu.memory_space<vmem>>, vector<1x128x16xf32>
    %1 = vector.shape_cast %0 : vector<1x128x16xf32> to vector<128x16xf32>
    %c0_2 = arith.constant 0 : index
    %c0_3 = arith.constant 0 : index
    %2 = vector.load %arg6[%c0_2, %c0_3] : memref<16x256xf32, #tpu.memory_space<vmem>>, vector<16x256xf32>
    %c0_4 = arith.constant 0 : index
    %c0_5 = arith.constant 0 : index
    %3 = vector.load %arg7[%c0_4, %c0_5] : memref<1x256xf32, #tpu.memory_space<vmem>>, vector<1x256xf32>
    %cst = arith.constant dense<0.000000e+00> : vector<128x256xf32>
    %4 = tpu.matmul %1, %2, %cst {dimension_numbers = #tpu.dot_dimension_numbers<[1], [0], [0], [1], [0, 0, 1, 1], [], []>} : vector<128x16xf32>, vector<16x256xf32>, vector<128x256xf32> -> vector<128x256xf32>
    %5 = vector.broadcast %3 : vector<1x256xf32> to vector<128x256xf32>
    %6 = arith.addf %4, %5 : vector<128x256xf32>
    %7 = vector.extract_strided_slice %6 {offsets = [0, 0], sizes = [128, 128], strides = [1, 1]} : vector<128x256xf32> to vector<128x128xf32>
    %8 = arith.negf %7 : vector<128x128xf32>
    %9 = math.exp %8 : vector<128x128xf32>
    %cst_6 = arith.constant 1.000000e+00 : f32
    %10 = vector.broadcast %cst_6 : f32 to vector<128x128xf32>
    %11 = arith.addf %10, %9 : vector<128x128xf32>
    %12 = arith.divf %10, %11 : vector<128x128xf32>
    %13 = vector.extract_strided_slice %6 {offsets = [0, 128], sizes = [128, 64], strides = [1, 1]} : vector<128x256xf32> to vector<128x64xf32>
    %14 = math.tanh %13 : vector<128x64xf32>
    %15 = vector.extract_strided_slice %12 {offsets = [0, 0], sizes = [128, 64], strides = [1, 1]} : vector<128x128xf32> to vector<128x64xf32>
    %16 = arith.mulf %15, %14 : vector<128x64xf32>
    %17 = vector.extract_strided_slice %12 {offsets = [0, 64], sizes = [128, 64], strides = [1, 1]} : vector<128x128xf32> to vector<128x64xf32>
    %18 = math.tanh %16 : vector<128x64xf32>
    %19 = arith.mulf %17, %18 : vector<128x64xf32>
    %c0_7 = arith.constant 0 : index
    %c0_8 = arith.constant 0 : index
    %20 = vector.load %arg8[%c0_7, %c0_8] : memref<64x256xf32, #tpu.memory_space<vmem>>, vector<64x256xf32>
    %c0_9 = arith.constant 0 : index
    %c0_10 = arith.constant 0 : index
    %21 = vector.load %arg9[%c0_9, %c0_10] : memref<1x256xf32, #tpu.memory_space<vmem>>, vector<1x256xf32>
    %cst_11 = arith.constant dense<0.000000e+00> : vector<128x256xf32>
    %22 = tpu.matmul %19, %20, %cst_11 {dimension_numbers = #tpu.dot_dimension_numbers<[1], [0], [0], [1], [0, 0, 1, 1], [], []>} : vector<128x64xf32>, vector<64x256xf32>, vector<128x256xf32> -> vector<128x256xf32>
    %23 = vector.broadcast %21 : vector<1x256xf32> to vector<128x256xf32>
    %24 = arith.addf %22, %23 : vector<128x256xf32>
    %25 = vector.extract_strided_slice %24 {offsets = [0, 0], sizes = [128, 128], strides = [1, 1]} : vector<128x256xf32> to vector<128x128xf32>
    %26 = arith.negf %25 : vector<128x128xf32>
    %27 = math.exp %26 : vector<128x128xf32>
    %cst_12 = arith.constant 1.000000e+00 : f32
    %28 = vector.broadcast %cst_12 : f32 to vector<128x128xf32>
    %29 = arith.addf %28, %27 : vector<128x128xf32>
    %30 = arith.divf %28, %29 : vector<128x128xf32>
    %31 = vector.extract_strided_slice %24 {offsets = [0, 128], sizes = [128, 64], strides = [1, 1]} : vector<128x256xf32> to vector<128x64xf32>
    %32 = math.tanh %31 : vector<128x64xf32>
    %33 = vector.extract_strided_slice %30 {offsets = [0, 0], sizes = [128, 64], strides = [1, 1]} : vector<128x128xf32> to vector<128x64xf32>
    %34 = arith.mulf %33, %32 : vector<128x64xf32>
    %35 = vector.extract_strided_slice %30 {offsets = [0, 64], sizes = [128, 64], strides = [1, 1]} : vector<128x128xf32> to vector<128x64xf32>
    %36 = math.tanh %34 : vector<128x64xf32>
    %37 = arith.mulf %35, %36 : vector<128x64xf32>
    %c0_13 = arith.constant 0 : index
    %c0_14 = arith.constant 0 : index
    %c0_15 = arith.constant 0 : index
    %38 = vector.load %arg3[%c0_13, %c0_14, %c0_15] : memref<1x1x64xf32, #tpu.memory_space<vmem>>, vector<1x1x64xf32>
    %39 = vector.shape_cast %38 : vector<1x1x64xf32> to vector<1x64xf32>
    %cst_16 = arith.constant dense<0.000000e+00> : vector<1x128xf32>
    %40 = tpu.matmul %39, %37, %cst_16 {dimension_numbers = #tpu.dot_dimension_numbers<[1], [1], [0], [0], [0, 0, 1, 0], [], []>} : vector<1x64xf32>, vector<128x64xf32>, vector<1x128xf32> -> vector<1x128xf32>
    %c0_17 = arith.constant 0 : index
    %c0_18 = arith.constant 0 : index
    %c0_19 = arith.constant 0 : index
    %41 = vector.load %arg4[%c0_17, %c0_18, %c0_19] : memref<1x1x128xf32, #tpu.memory_space<vmem>>, vector<1x1x128xf32>
    %42 = vector.shape_cast %41 : vector<1x1x128xf32> to vector<1x128xf32>
    %c0_20 = arith.constant 0 : index
    %c0_21 = arith.constant 0 : index
    %43 = memref.load %arg5[%c0_20, %c0_21] : memref<1x1xf32, #tpu.memory_space<smem>>
    %44 = vector.broadcast %43 : f32 to vector<1x128xf32>
    %45 = arith.mulf %42, %44 : vector<1x128xf32>
    %46 = arith.addf %40, %45 : vector<1x128xf32>
    %c0_22 = arith.constant 0 : index
    %c0_23 = arith.constant 0 : index
    %c0_24 = arith.constant 0 : index
    %47 = vector.load %arg10[%c0_22, %c0_23, %c0_24] : memref<1x1x128xf32, #tpu.memory_space<vmem>>, vector<1x1x128xf32>
    %48 = vector.shape_cast %47 : vector<1x1x128xf32> to vector<1x128xf32>
    %49 = vector.shape_cast %46 : vector<1x128xf32> to vector<1x1x128xf32>
    tpu.vector_store %arg10[%c0_22, %c0_23, %c0_24], %49 {strides = array<i32>} : memref<1x1x128xf32, #tpu.memory_space<vmem>>, vector<1x1x128xf32>,
    return
  }
  func.func @transform_0(%arg0: i32, %arg1: i32) -> (i32, i32, i32) {
    %c0_i32 = arith.constant 0 : i32
    %c0_i32_0 = arith.constant 0 : i32
    return %arg0, %arg1, %c0_i32 : i32, i32, i32
  }
  func.func @transform_1(%arg0: i32, %arg1: i32) -> (i32, i32, i32) {
    %c0_i32 = arith.constant 0 : i32
    %c0_i32_0 = arith.constant 0 : i32
    %c0_i32_1 = arith.constant 0 : i32
    return %arg0, %c0_i32, %c0_i32_0 : i32, i32, i32
  }
  func.func @transform_2(%arg0: i32, %arg1: i32) -> (i32, i32, i32) {
    %c0_i32 = arith.constant 0 : i32
    %c0_i32_0 = arith.constant 0 : i32
    return %arg0, %c0_i32, %arg1 : i32, i32, i32
  }
  func.func @transform_3(%arg0: i32, %arg1: i32) -> (i32, i32) {
    %c0_i32 = arith.constant 0 : i32
    %c0_i32_0 = arith.constant 0 : i32
    %c0_i32_1 = arith.constant 0 : i32
    return %c0_i32, %c0_i32_0 : i32, i32
  }
  func.func @transform_4(%arg0: i32, %arg1: i32) -> (i32, i32) {
    %c0_i32 = arith.constant 0 : i32
    %c0_i32_0 = arith.constant 0 : i32
    %c0_i32_1 = arith.constant 0 : i32
    return %c0_i32, %c0_i32_0 : i32, i32
  }
  func.func @transform_5(%arg0: i32, %arg1: i32) -> (i32, i32) {
    %c0_i32 = arith.constant 0 : i32
    %c0_i32_0 = arith.constant 0 : i32
    %c0_i32_1 = arith.constant 0 : i32
    return %c0_i32, %c0_i32_0 : i32, i32
  }
  func.func @transform_6(%arg0: i32, %arg1: i32) -> (i32, i32) {
    %c0_i32 = arith.constant 0 : i32
    %c0_i32_0 = arith.constant 0 : i32
    %c0_i32_1 = arith.constant 0 : i32
    return %c0_i32, %c0_i32_0 : i32, i32
  }
  func.func @transform_7(%arg0: i32, %arg1: i32) -> (i32, i32) {
    %c0_i32 = arith.constant 0 : i32
    %c0_i32_0 = arith.constant 0 : i32
    %c0_i32_1 = arith.constant 0 : i32
    return %c0_i32, %c0_i32_0 : i32, i32
  }
  func.func @transform_8(%arg0: i32, %arg1: i32) -> (i32, i32, i32) {
    %c0_i32 = arith.constant 0 : i32
    %c0_i32_0 = arith.constant 0 : i32
    return %arg0, %c0_i32, %arg1 : i32, i32, i32
  }
}

</mosaic_0001>

<bundles_post_ra>
// kernel: bilstm_bne_forward.2
= control target key start
LH: loop header
LB: loop body
LE: loop exit
PB: predicated region body
PF: predicated region fallthrough
CT: control target
= control target key end

     0   :  { %12 = vsyncpa [#allocation3], 0  ;;  %s621_s0 = inlined_call_operand.hbm [shape: f32[2,16], index: 0, kind: input, shape index: {}]   ;;  %s622_s1 = inlined_call_operand.vmem [shape: f32[16,256], index: 1, kind: input, shape index: {}]   ;;  %s623_s2 = inlined_call_operand.vmem [shape: f32[64,256], index: 2, kind: input, shape index: {}]   ;;  %s624_s3 = inlined_call_operand.vmem [shape: f32[1,256], index: 3, kind: input, shape index: {}]   ;;  %s625_s4 = inlined_call_operand.vmem [shape: f32[64,256], index: 4, kind: input, shape index: {}]   ;;  %s626_s5 = inlined_call_operand.hbm [shape: f32[64,256], index: 5, kind: input, shape index: {}]   ;;  %s627_s6 = inlined_call_operand.hbm [shape: f32[1,256], index: 6, kind: input, shape index: {}]   ;;  %s628_s7 = inlined_call_operand.vmem [shape: f32[2,1,64], index: 7, kind: output, shape index: {}]  }
   0x1   :  { %13 = vsyncpa [#allocation5], 0  ;;  %s452_s24 = smov [#allocation4]   ;;  %s382_s27 = scalar_lea.hbm %s626_s5, 2048 }
   0x2   :  { %s37_s25 = sshll.u32 %s452_s24, 4  ;;  %p383_p0 = scmp.ne.s32.totalorder %s626_s5, %s382_s27  ;;  %s38_s25 = int_to_ptr.vmem [resolvable:$true] %s37_s25 }
   0x3   :  { %p386_p1 = scmp.lt.u32.totalorder %s382_s27, %s626_s5 }
   0x5   :  { %p388_p2 = pnand %p386_p1, %p383_p0 }
   0x7   :  { %391 = shalt.err (!%p388_p2)
}
   0x8   :  { %s392_s9 = scalar_lea.vmem %s38_s25, 2048  ;;  %p397_p4 = scmp.lt.s32.totalorder %s38_s25, %s38_s25 }
   0x9   :  { %p393_p3 = scmp.ne.s32.totalorder %s38_s25, %s392_s9  ;;  %p398_p5 = scmp.lt.s32.totalorder %s392_s9, %s392_s9 }
   0xb   :  { %p399_p6 = por %p398_p5, %p397_p4 }
   0xd   :  { %p400_p7 = pnand %p399_p6, %p393_p3 }
   0xf   :  { %403 = shalt.err (!%p400_p7)
}
  0x10   :  { %s453_s10 = smov 256   ;;  %s454_s11 = smov 16  }
  0x11   :  { %43 = dma.hbm_to_vmem [thread:$0]  %s626_s5, 2048, %s38_s25, [#allocation5], %s453_s10, %s453_s10, %s454_s11  }
  0x12   :  { %s455_s14 = smov [#allocation2]   ;;  %s456_s16 = smov [#allocation6]  }
  0x13   :  { %s20_s15 = sshll.u32 %s455_s14, 4  ;;  %s50_s17 = sshll.u32 %s456_s16, 4  ;;  %s21_s15 = int_to_ptr.vmem [resolvable:$true] %s20_s15  ;;  %s51_s17 = int_to_ptr.vmem [resolvable:$true] %s50_s17 }
  0x14   :  { %s404_s20 = scalar_lea.hbm %s621_s0, 32 }
  0x15   :  { %p405_p8 = scmp.ne.s32.totalorder %s621_s0, %s404_s20  ;;  %p408_p9 = scmp.lt.u32.totalorder %s404_s20, %s621_s0 }
  0x17   :  { %p410_p10 = pnand %p408_p9, %p405_p8 }
  0x19   :  { %413 = shalt.err (!%p410_p10)
}
  0x1a   :  { %s414_s5 = scalar_lea.vmem %s21_s15, 32  ;;  %p419_p12 = scmp.lt.s32.totalorder %s21_s15, %s21_s15 }
  0x1b   :  { %p415_p11 = scmp.ne.s32.totalorder %s21_s15, %s414_s5  ;;  %p420_p13 = scmp.lt.s32.totalorder %s414_s5, %s414_s5 }
  0x1d   :  { %p421_p0 = por %p420_p13, %p419_p12 }
  0x1f   :  { %p422_p1 = pnand %p421_p0, %p415_p11 }
  0x21   :  { %425 = shalt.err (!%p422_p1)
}
  0x22   :  { %23 = dma.hbm_to_vmem [thread:$0]  %s621_s0, 32, %s21_s15, [#allocation3]  }
  0x23   :  { %s426_s28 = scalar_lea.hbm %s627_s6, 32 }
  0x24   :  { %p427_p2 = scmp.ne.s32.totalorder %s627_s6, %s426_s28  ;;  %p430_p3 = scmp.lt.u32.totalorder %s426_s28, %s627_s6 }
  0x26   :  { %p432_p4 = pnand %p430_p3, %p427_p2 }
  0x28   :  { %435 = shalt.err (!%p432_p4)
}
  0x29   :  { %s436_s10 = scalar_lea.vmem %s51_s17, 32  ;;  %p441_p6 = scmp.lt.s32.totalorder %s51_s17, %s51_s17 }
  0x2a   :  { %p437_p5 = scmp.ne.s32.totalorder %s51_s17, %s436_s10  ;;  %p442_p7 = scmp.lt.s32.totalorder %s436_s10, %s436_s10 }
  0x2c   :  { %p443_p8 = por %p442_p7, %p441_p6 }
  0x2e   :  { %p444_p9 = pnand %p443_p8, %p437_p5 }
  0x30   :  { %447 = shalt.err (!%p444_p9)
}
  0x31   :  { %53 = dma.hbm_to_vmem [thread:$0]  %s627_s6, 32, %s51_s17, [#allocation5]  }
  0x32   :  { %448 = dma.done.wait [#allocation3], 32  }
  0x33   :  { %449 = vsyncadd [#allocation3], 4294967264 }
  0x34   :  { %450 = dma.done.wait [#allocation5], 2080  }
  0x35   :  { %451 = vsyncadd [#allocation5], 4294965216  ;;  %v457_v0 = vmov 0.0   ;;  %v66_v1 = vld [vmem:[%s622_s1 + $0x8] sm:$0xff]  ;;  %v68_v2 = vld [vmem:[%s622_s1 + $0x18] sm:$0xff]  ;;  %vm80_vm0 = vcmask 130048   ;;  %v70_v8 = vlaneseq }
  0x36   :  { %148 = vmatprep.mubr.f32.mxu0 %v457_v0  ;;  %267 = vmatprep.mubr.f32.mxu1 %v457_v0  ;;  %v65_v3 = vld [vmem:[%s622_s1] sm:$0xff]  ;;  %v338_v4 = vpack.c.bf16 %v68_v2, %v66_v1  ;;  %v67_v5 = vld [vmem:[%s622_s1 + $0x10] sm:$0xff]  ;;  %v171_v25 = vld [vmem:[%s625_s4 + $0x8] sm:$0xff]  ;;  %s458_s22 = smov 64   ;;  %vm200_vm1 = vcmask 523264   ;;  %vm325_vm2 = vcmask 516096  }
  0x37   :  { %v340_v6 = vpack.c.bf16 %v67_v5, %v65_v3  ;;  %v63_v7 = vld [vmem:[#allocation2] sm:$0x3]  ;;  %v548_v9 = vshrl.u32 %v70_v8, 7  ;;  %v173_v26 = vld [vmem:[%s625_s4 + $0x18] sm:$0xff]  ;;  %v172_v29 = vld [vmem:[%s625_s4 + $0x10] sm:$0xff] }
  0x38   :  { %339 = vmatprep.subr.bf16.mxu0 %v338_v4  ;;  %v64_v11 = vld [vmem:[%s624_s3] sm:$0x3]  ;;  %v342_v28 = vpack.c.bf16 %v173_v26, %v171_v25  ;;  %v175_v30 = vld [vmem:[%s625_s4 + $0x28] sm:$0xff]  ;;  %v177_v31 = vld [vmem:[%s625_s4 + $0x38] sm:$0xff]  ;;  %v459_v3 = vmov 1966171168  }
  0x39   :  { %341 = vmatpush1.bf16.msra.mxu0 %v340_v6  ;;  %v551_v10 = vsub.s32 0, %v548_v9  ;;  %v76_v17 = vsub.s32 1, %v548_v9  ;;  %v170_v27 = vld [vmem:[%s625_s4] sm:$0xff]  ;;  %v346_v33 = vpack.c.bf16 %v177_v31, %v175_v30  ;;  %v176_v35 = vld [vmem:[%s625_s4 + $0x30] sm:$0xff]  ;;  %v179_v36 = vld [vmem:[%s625_s4 + $0x48] sm:$0xff]  ;;  %v290_v4 = vunpack.c.l.s4 %v459_v3 }
  0x3a   :  { %v344_v32 = vpack.c.bf16 %v172_v29, %v170_v27  ;;  %v174_v34 = vld [vmem:[%s625_s4 + $0x20] sm:$0xff]  ;;  %343 = vmatprep.subr.bf16.mxu1 %v342_v28  ;;  %v181_v37 = vld [vmem:[%s625_s4 + $0x58] sm:$0xff]  ;;  %v180_v41 = vld [vmem:[%s625_s4 + $0x50] sm:$0xff] }
  0x3b   :  { %v73_v12 = vrot.slane %v64_v11, %v551_v10  ;;  %v77_v18 = vrot.slane %v64_v11, %v76_v17  ;;  %v348_v38 = vpack.c.bf16 %v176_v35, %v174_v34  ;;  %v350_v39 = vpack.c.bf16 %v181_v37, %v179_v36  ;;  %v178_v40 = vld [vmem:[%s625_s4 + $0x40] sm:$0xff]  ;;  %v183_v42 = vld [vmem:[%s625_s4 + $0x68] sm:$0xff]  ;;  %v185_v43 = vld [vmem:[%s625_s4 + $0x78] sm:$0xff] }
  0x3c   :  { %334 = vmatmul.mubr.msk.f32.vlgmr.msra.gmra.mrb[0].mxu0 %vm80_vm0, %v63_v7  ;;  %345 = vmatpush1.bf16.msra.mxu1 %v344_v32  ;;  %v352_v44 = vpack.c.bf16 %v180_v41, %v178_v40  ;;  %v354_v45 = vpack.c.bf16 %v185_v43, %v183_v42  ;;  %v182_v46 = vld [vmem:[%s625_s4 + $0x60] sm:$0xff]  ;;  %v184_v47 = vld [vmem:[%s625_s4 + $0x70] sm:$0xff]  ;;  %v291_v5 = vunpack.c.0.s8 %v290_v4 }
  0x3d   :  { %347 = vmatprep.subr.bf16.mxu1 %v346_v33  ;;  %v356_v49 = vpack.c.bf16 %v184_v47, %v182_v46  ;;  %v169_v53 = vld [vmem:[#allocation6] sm:$0x3] }
  0x3e   :  { %v190_v54 = vrot.slane %v169_v53, %v551_v10  ;;  %v194_v59 = vrot.slane %v169_v53, %v76_v17  ;;  %v294_v6 = vsub.s32 %v291_v5, %v548_v9 }
  0x40   :  { %349 = vmatpush1.bf16.msra.mxu1 %v348_v38 }
  0x41   :  { %351 = vmatprep.subr.bf16.mxu1 %v350_v39 }
  0x44   :  { %353 = vmatpush1.bf16.msra.mxu1 %v352_v44 }
  0x45   :  { %355 = vmatprep.subr.bf16.mxu1 %v354_v45 }
  0x48   :  { %357 = vmatpush1.bf16.msra.mxu1 %v356_v49 }
 0x10f   :  { %v150_v13 = vpop.f32.mrb[0].mxu0 }
 0x110   :  { %v151_v14 = vadd.f32 %v150_v13, %v73_v12  ;;  %v152_v15 = vpop.f32.mrb[1].mxu0 }
 0x111   :  { %v153_v19 = vadd.f32 %v152_v15, %v77_v18 }
 0x112   :  { %v335_v16 = vmul.f32 -1.442695, %v151_v14 }
 0x114   :  { %366 = vpow2.f32 %v335_v16 }
 0x115   :  { %368 = vtanh.f32 %v153_v19 }
 0x11e   :  { %v367_v20 = vpop.eup %366 }
 0x11f   :  { %v158_v21 = vadd.f32 1.0, %v367_v20  ;;  %v369_v22 = vpop.eup %368 }
 0x121   :  { %370 = vrcp.f32 %v158_v21 }
 0x12b   :  { %v371_v23 = vpop.eup %370 }
 0x12c   :  { %v162_v24 = vmul.f32 %v371_v23, %v369_v22 }
 0x12e   :  { %372 = vtanh.f32 %v162_v24 }
 0x138   :  { %v373_v48 = vpop.eup %372 }
 0x139   :  { %165 = vrot.lane.b32.xlu0 %v373_v48, %s458_s22 }
 0x1ab   :  { %v166_v50 = vpop.permute.xlu0 %165 }
 0x1ac   :  { %v168_v51 = vmul.f32 %v371_v23, %v166_v50 }
 0x1ae   :  { %198 = vrot.lane.b32.xlu0 %v168_v51, %s458_s22 }
 0x220   :  { %v199_v52 = vpop.permute.xlu0 %198 }
 0x221   :  { %336 = vmatmul.mubr.msk.f32.vlgmr.msra.gmra.mrb[0].mxu1 %vm200_vm1, %v199_v52 }
 0x2f4   :  { %v269_v55 = vpop.f32.mrb[0].mxu1 }
 0x2f5   :  { %v270_v56 = vadd.f32 %v269_v55, %v190_v54  ;;  %v271_v57 = vpop.f32.mrb[1].mxu1 }
 0x2f6   :  { %v272_v60 = vadd.f32 %v271_v57, %v194_v59 }
 0x2f7   :  { %v337_v58 = vmul.f32 -1.442695, %v270_v56 }
 0x2f9   :  { %374 = vpow2.f32 %v337_v58 }
 0x2fa   :  { %376 = vtanh.f32 %v272_v60 }
 0x303   :  { %v375_v61 = vpop.eup %374 }
 0x304   :  { %v277_v62 = vadd.f32 1.0, %v375_v61  ;;  %v377_v63 = vpop.eup %376 }
 0x306   :  { %378 = vrcp.f32 %v277_v62 }
 0x310   :  { %v379_v0 = vpop.eup %378 }
 0x311   :  { %v281_v1 = vmul.f32 %v379_v0, %v377_v63 }
 0x313   :  { %380 = vtanh.f32 %v281_v1 }
 0x31d   :  { %v381_v2 = vpop.eup %380 }
 0x31e   :  { %284 = vrot.lane.b32.xlu1 %v381_v2, %s458_s22 }
 0x390   :  { %v285_v7 = vpop.permute.xlu1 %284 }
 0x391   :  { %v287_v8 = vmul.f32 %v379_v0, %v285_v7 }
 0x393   :  { %v295_v11 = vrot.slane %v287_v8, %v294_v6 }
 0x395   :  { %v296_v12 = vcombine.high %v295_v11, %v295_v11  ;;  %v303_v13 = vrot.slane %v295_v11, %v294_v6 }
 0x397   :  { %v314_v14 = vrot.slane %v303_v13, %v551_v10  ;;  %v310_v15 = vrot.slane %v296_v12, %v294_v6 }
 0x399   :  { %319 = vrot.lane.b32.xlu1 %v314_v14, %s458_s22  ;;  %v318_v16 = vrot.slane %v310_v15, %v551_v10 }
 0x39b   :  { %321 = vrot.lane.b32.xlu0 %v318_v16, %s458_s22 }
 0x40b   :  { %v320_v17 = vpop.permute.xlu1 %319 }
 0x40c   :  { %326 = vst.msk [vmem:[%s628_s7] sm:$0x1] %vm325_vm2, %v320_v17 }
 0x40d   :  { %v322_v9 = vpop.permute.xlu0 %321 }
 0x40e   :  { %327 = vst.msk [vmem:[%s628_s7 + $0x1] sm:$0x1] %vm325_vm2, %v322_v9 }
 0x40f   :  { %332 = vsyncpa [#allocation3], 1 }
 0x410   :  { %333 = vsyncpa [#allocation5], 1 }

// kernel: bilstm_bne_forward.3
= control target key start
LH: loop header
LB: loop body
LE: loop exit
PB: predicated region body
PF: predicated region fallthrough
CT: control target
= control target key end

     0   :  { %s2848_s0 = inlined_call_operand.vmem [shape: f32[2,128,16], index: 0, kind: input, shape index: {}]   ;;  %s2849_s1 = inlined_call_operand.vmem [shape: f32[2,1,64], index: 1, kind: input, shape index: {}]   ;;  %s2850_s2 = inlined_call_operand.vmem [shape: f32[2,1,128], index: 2, kind: input, shape index: {}]   ;;  %s2851_s3 = inlined_call_operand.<no memory space> [shape: f32[1,1], index: 3, kind: input, shape index: {}]   ;;  %s2852_s4 = inlined_call_operand.vmem [shape: f32[16,256], index: 4, kind: input, shape index: {}]   ;;  %s2853_s5 = inlined_call_operand.vmem [shape: f32[1,256], index: 5, kind: input, shape index: {}]   ;;  %s2854_s6 = inlined_call_operand.vmem [shape: f32[64,256], index: 6, kind: input, shape index: {}]   ;;  %s2855_s7 = inlined_call_operand.vmem [shape: f32[1,256], index: 7, kind: input, shape index: {}]   ;;  %s2856_s8 = inlined_call_operand.hbm [shape: f32[2,1,128], index: 8, kind: output, shape index: {}]  }
   0x1   :  { %13 = sst [smem:[#allocation2]] %s2851_s3 }
   0x2   :  { %14 = vsyncpa [#allocation4], 0 }
   0x3   :  { %16 = vsyncpa [#allocation4 + $0x1], 0  ;;  %s2281_s29 = smov 0   ;;  %s2283_s30 = smov 0  }
   0x4   :  { %s2285_s9 = smov 0   ;;  %s2287_s10 = smov 0  }
   0x5   :  { %s2289_s11 = smov 0   ;;  %s2291_s12 = smov 0  }
   0x6 LB: > { %s1597_s3 = sadd.s32 4294967295, %s2226_s12   ;;  %s1598_s13 = sadd.s32 4294967294, %s2226_s12   ;;  %s2226_s12 = sphi %s2291_s12, %s22_s12   ;;  %s2222_s11 = sphi %s2289_s11, %s2865_s11   ;;  %s2218_s10 = sphi %s2287_s10, %s2864_s10   ;;  %s2214_s9 = sphi %s2285_s9, %s2863_s9   ;;  %s2210_s30 = sphi %s2283_s30, %s2862_s30   ;;  %s2206_s29 = sphi %s2281_s29, %s2861_s29  }
   0x7   : > { %s34_s14 = sadd.s32 1, %s2222_s11  ;;  %s230_s15 = sadd.s32 1, %s2214_s9 }
   0x8   : > { %p36_p0 = scmp.ge.s32.totalorder %s34_s14, 2  ;;  %p240_p1 = scmp.ne.s32.totalorder %s2214_s9, %s2210_s30 }
   0x9   : > { %p241_p2 = scmp.eq.s32.totalorder %s1597_s3, 1  ;;  %p246_p3 = scmp.ne.s32.totalorder %s2210_s30, %s2206_s29 }
   0xa   : > { %s2867_s14 = smov (%p36_p0, %s34_s14), 0  ;;  %p247_p5 = scmp.eq.s32.totalorder %s1598_s13, 1 }
   0xb   : > { %p2321_p4 = por %p241_p2, %p240_p1  ;;  %s225_s17 = ssub.s32 %s2222_s11, %s2867_s14 }
   0xc   : > { %p1601_p6 = scmp.ge.s32.totalorder %s2226_s12, 1  ;;  %p228_p7 = scmp.eq.s32.totalorder %s225_s17, 0 }
   0xd   : > { %p2328_p8 = por %p247_p5, %p246_p3  ;;  %p308_p9 = scmp.lt.s32.totalorder %s2226_s12, 3 }
   0xe   : > { %s2334_s19 = scalar_select %p228_p7, %s2214_s9, %s230_s15  }
   0xf   : > { %p309_p10 = pnand %p1601_p6, %p308_p9 }
  0x10   : > { %v390_v0 = vld [vmem:[%s2852_s4 + $0x8] sm:$0xff] (!%p309_p10)  ;;  %v392_v1 = vld [vmem:[%s2852_s4 + $0x18] sm:$0xff] (!%p309_p10)  ;;  %v389_v2 = vld [vmem:[%s2852_s4] sm:$0xff] (!%p309_p10)  ;;  %p355_p11 = scmp.lt.s32.totalorder (!%p309_p10), %s2218_s10, 1  ;;  %v2228_v5 = vmov (!%p309_p10), 0.0   ;;  %vm405_vm0 = vcmask (!%p309_p10), 130048   ;;  %v395_v23 = vlaneseq (!%p309_p10) }
  0x11   : > { %312 = sbr.rel (%p309_p10) target bundleno = 1300 (0x514), region = 52  ;;  %v1741_v3 = vpack.c.bf16 (!%p309_p10), %v392_v1, %v390_v0  ;;  %v391_v4 = vld [vmem:[%s2852_s4 + $0x10] sm:$0xff] (!%p309_p10)  ;;  %518 = vmatprep.mubr.f32.mxu0 (!%p309_p10), %v2228_v5  ;;  %1012 = vmatprep.mubr.f32.mxu1 (!%p309_p10), %v2228_v5  ;;  %v393_v26 = vld [vmem:[%s2853_s5] sm:$0x3] (!%p309_p10)  ;;  %s2229_s22 = smov (!%p309_p10), 64   ;;  %vm915_vm1 = vcmask (!%p309_p10), 523264  }
  0x12   : > { %v1743_v6 = vpack.c.bf16 (!%p309_p10), %v391_v4, %v389_v2  ;;  %v2407_v24 = vshrl.u32 (!%p309_p10), %v395_v23, 7  ;;  %vm2231_vm2 = vmmov (!%p309_p10), 0   ;;  %vm2760_vm3 = vmpackc.low (!%p309_p10), %vm915_vm1, %vm915_vm1  ;;  %s1335_s26 = sld [smem:[#allocation2]] (!%p309_p10)  ;;  %s352_s15 = sand.u32 (!%p309_p10), 1, %s2210_s30  }
  0x13   : > { %1742 = vmatprep.subr.bf16.mxu0 (!%p309_p10), %v1741_v3  ;;  %s353_s20 = scalar_lea.vmem (!%p309_p10), [#allocation3], %s352_s15 }
  0x14   : > { %1744 = vmatpush1.bf16.msra.mxu0 (!%p309_p10), %v1743_v6  ;;  %v397_v25 = vsub.s32 (!%p309_p10), 0, %v2407_v24  ;;  %v401_v32 = vsub.s32 (!%p309_p10), 1, %v2407_v24  ;;  %s1506_s21 = sshll.u32 (!%p309_p10), %s353_s20, 4  ;;  %s2803_s21 = int_to_ptr.vmem [resolvable:$true] %s1506_s21 }
  0x16   : > { %v2415_v27 = vrot.slane (!%p309_p10), %v393_v26, %v397_v25  ;;  %v2422_v37 = vrot.slane (!%p309_p10), %v393_v26, %v401_v32 }
  0x18   : > { %s2352_s28 = scalar_select %p355_p11, %s2218_s10, 1 }
  0x1a   : > { %s1688_s3 = sshll.u32 %s2352_s28, 7  ;;  %s366_s25 = scalar_lea.vmem %s2849_s1, %s2352_s28 }
  0x1b   : > { %s2358_s17 = scalar_lea.vmem %s2848_s0, %s1688_s3  ;;  %s372_s13 = scalar_lea.vmem %s2850_s2, %s2352_s28 }
  0x1c   : > { %v373_v7 = vld [vmem:[%s2358_s17] sm:$0xff]  ;;  %v374_v8 = vld [vmem:[%s2358_s17 + $0x8] sm:$0xff]  ;;  %v375_v9 = vld [vmem:[%s2358_s17 + $0x10] sm:$0xff]  ;;  %s1493_s28 = scalar_lea.sflag [#allocation4], %s352_s15 }
  0x1d   : > { %1604 = vmatmul.mubr.msk.f32.vlgmr.msra.gmra.mrb[0].mxu0 %vm405_vm0, %v373_v7  ;;  %v376_v10 = vld [vmem:[%s2358_s17 + $0x18] sm:$0xff]  ;;  %v377_v11 = vld [vmem:[%s2358_s17 + $0x20] sm:$0xff]  ;;  %v378_v12 = vld [vmem:[%s2358_s17 + $0x28] sm:$0xff] }
  0x1e   : > { %524 = vmatprep.mubr.f32.mxu0 %v2228_v5  ;;  %v379_v13 = vld [vmem:[%s2358_s17 + $0x30] sm:$0xff]  ;;  %v380_v14 = vld [vmem:[%s2358_s17 + $0x38] sm:$0xff]  ;;  %v381_v15 = vld [vmem:[%s2358_s17 + $0x40] sm:$0xff] }
  0x1f   : > { %v382_v16 = vld [vmem:[%s2358_s17 + $0x48] sm:$0xff]  ;;  %v383_v17 = vld [vmem:[%s2358_s17 + $0x50] sm:$0xff]  ;;  %v384_v18 = vld [vmem:[%s2358_s17 + $0x58] sm:$0xff] }
  0x20   : > { %v385_v19 = vld [vmem:[%s2358_s17 + $0x60] sm:$0xff]  ;;  %v386_v20 = vld [vmem:[%s2358_s17 + $0x68] sm:$0xff]  ;;  %v387_v21 = vld [vmem:[%s2358_s17 + $0x70] sm:$0xff] }
  0x21   : > { %1605 = vmatmul.mubr.msk.f32.gmra.mrb[2].mxu0 %vm405_vm0, %v374_v8  ;;  %v388_v22 = vld [vmem:[%s2358_s17 + $0x78] sm:$0xff]  ;;  %s1685_s17 = sshll.u32 %s2218_s10, 4  ;;  %s2232_s10 = smov [#allocation3]  }
  0x22   : > { %530 = vmatprep.mubr.f32.mxu0 %v2228_v5  ;;  %s2801_s24 = scalar_lea.hbm %s2856_s8, %s1685_s17 }
  0x25   : > { %1606 = vmatmul.mubr.msk.f32.gmra.mrb[4].mxu0 %vm405_vm0, %v375_v9 }
  0x26   : > { %536 = vmatprep.mubr.f32.mxu0 %v2228_v5 }
  0x29   : > { %1607 = vmatmul.mubr.msk.f32.gmra.mrb[6].mxu0 %vm405_vm0, %v376_v10 }
  0x2a   : > { %542 = vmatprep.mubr.f32.mxu0 %v2228_v5 }
  0x2d   : > { %1608 = vmatmul.mubr.msk.f32.gmra.mrb[8].mxu0 %vm405_vm0, %v377_v11 }
  0x2e   : > { %548 = vmatprep.mubr.f32.mxu0 %v2228_v5 }
  0x31   : > { %1609 = vmatmul.mubr.msk.f32.gmra.mrb[10].mxu0 %vm405_vm0, %v378_v12 }
  0x32   : > { %554 = vmatprep.mubr.f32.mxu0 %v2228_v5 }
  0x35   : > { %1610 = vmatmul.mubr.msk.f32.gmra.mrb[12].mxu0 %vm405_vm0, %v379_v13 }
  0x36   : > { %560 = vmatprep.mubr.f32.mxu0 %v2228_v5 }
  0x39   : > { %1611 = vmatmul.mubr.msk.f32.gmra.mrb[14].mxu0 %vm405_vm0, %v380_v14 }
  0x3a   : > { %566 = vmatprep.mubr.f32.mxu0 %v2228_v5 }
  0x3d   : > { %1612 = vmatmul.mubr.msk.f32.gmra.mrb[16].mxu0 %vm405_vm0, %v381_v15 }
  0x3e   : > { %572 = vmatprep.mubr.f32.mxu0 %v2228_v5 }
  0x41   : > { %1613 = vmatmul.mubr.msk.f32.gmra.mrb[18].mxu0 %vm405_vm0, %v382_v16 }
  0x42   : > { %578 = vmatprep.mubr.f32.mxu0 %v2228_v5 }
  0x45   : > { %1614 = vmatmul.mubr.msk.f32.gmra.mrb[20].mxu0 %vm405_vm0, %v383_v17 }
  0x46   : > { %584 = vmatprep.mubr.f32.mxu0 %v2228_v5 }
  0x49   : > { %1615 = vmatmul.mubr.msk.f32.gmra.mrb[22].mxu0 %vm405_vm0, %v384_v18 }
  0x4a   : > { %590 = vmatprep.mubr.f32.mxu0 %v2228_v5 }
  0x4d   : > { %1616 = vmatmul.mubr.msk.f32.gmra.mrb[24].mxu0 %vm405_vm0, %v385_v19 }
  0x4e   : > { %596 = vmatprep.mubr.f32.mxu0 %v2228_v5 }
  0x51   : > { %1617 = vmatmul.mubr.msk.f32.gmra.mrb[26].mxu0 %vm405_vm0, %v386_v20 }
  0x52   : > { %602 = vmatprep.mubr.f32.mxu0 %v2228_v5 }
  0x55   : > { %1618 = vmatmul.mubr.msk.f32.gmra.mrb[28].mxu0 %vm405_vm0, %v387_v21 }
  0x56   : > { %608 = vmatprep.mubr.f32.mxu0 %v2228_v5 }
  0x59   : > { %1619 = vmatmul.mubr.msk.f32.gmra.mrb[30].mxu0 %vm405_vm0, %v388_v22 }
  0x5a   : > { %1738 = vmatprep.mubr.msk.f32.mxu0 %vm2231_vm2, %v2228_v5 }
  0xf0   : > { %v520_v28 = vpop.f32.mrb[0].mxu0 }
  0xf1   : > { %v521_v29 = vadd.f32 %v520_v28, %v2415_v27  ;;  %v522_v30 = vpop.f32.mrb[1].mxu0 }
  0xf2   : > { %v523_v42 = vadd.f32 %v522_v30, %v2422_v37 }
  0xf3   : > { %v1620_v31 = vmul.f32 -1.442695, %v521_v29 }
  0xf4   : > { %v526_v33 = vpop.f32.mrb[2].mxu0 }
  0xf5   : > { %1892 = vpow2.f32 %v1620_v31  ;;  %v527_v34 = vadd.f32 %v526_v33, %v2415_v27  ;;  %v528_v35 = vpop.f32.mrb[3].mxu0 }
  0xf6   : > { %v529_v49 = vadd.f32 %v528_v35, %v2422_v37 }
  0xf7   : > { %v1621_v36 = vmul.f32 -1.442695, %v527_v34 }
  0xf8   : > { %v532_v38 = vpop.f32.mrb[4].mxu0 }
  0xf9   : > { %1894 = vpow2.f32 %v1621_v36  ;;  %v533_v39 = vadd.f32 %v532_v38, %v2415_v27  ;;  %v534_v40 = vpop.f32.mrb[5].mxu0 }
  0xfa   : > { %v535_v56 = vadd.f32 %v534_v40, %v2422_v37 }
  0xfb   : > { %v1622_v41 = vmul.f32 -1.442695, %v533_v39 }
  0xfc   : > { %v538_v43 = vpop.f32.mrb[6].mxu0 }
  0xfd   : > { %1896 = vpow2.f32 %v1622_v41  ;;  %v539_v44 = vadd.f32 %v538_v43, %v2415_v27  ;;  %v540_v45 = vpop.f32.mrb[7].mxu0 }
  0xfe   : > { %1898 = vtanh.f32 %v523_v42  ;;  %v541_v63 = vadd.f32 %v540_v45, %v2422_v37 }
  0xff   : > { %v1893_v46 = vpop.eup %1892  ;;  %v1623_v47 = vmul.f32 -1.442695, %v539_v44 }
 0x100   : > { %v663_v48 = vadd.f32 1.0, %v1893_v46  ;;  %v544_v50 = vpop.f32.mrb[8].mxu0 }
 0x101   : > { %1900 = vpow2.f32 %v1623_v47  ;;  %v545_v51 = vadd.f32 %v544_v50, %v2415_v27  ;;  %v546_v52 = vpop.f32.mrb[9].mxu0 }
 0x102   : > { %1902 = vrcp.f32 %v663_v48  ;;  %v547_v9 = vadd.f32 %v546_v52, %v2422_v37 }
 0x103   : > { %v1895_v53 = vpop.eup %1894  ;;  %v1624_v54 = vmul.f32 -1.442695, %v545_v51  ;;  %1904 = vtanh.f32 %v529_v49 }
 0x104   : > { %v664_v55 = vadd.f32 1.0, %v1895_v53  ;;  %v550_v57 = vpop.f32.mrb[10].mxu0 }
 0x105   : > { %1906 = vpow2.f32 %v1624_v54  ;;  %v551_v58 = vadd.f32 %v550_v57, %v2415_v27  ;;  %v552_v59 = vpop.f32.mrb[11].mxu0 }
 0x106   : > { %1908 = vrcp.f32 %v664_v55  ;;  %v553_v19 = vadd.f32 %v552_v59, %v2422_v37 }
 0x107   : > { %v1897_v60 = vpop.eup %1896  ;;  %v1625_v61 = vmul.f32 -1.442695, %v551_v58  ;;  %1910 = vtanh.f32 %v535_v56 }
 0x108   : > { %v665_v62 = vadd.f32 1.0, %v1897_v60  ;;  %v556_v0 = vpop.f32.mrb[12].mxu0  ;;  %v1899_v3 = vpop.eup %1898 }
 0x109   : > { %1912 = vpow2.f32 %v1625_v61  ;;  %v557_v1 = vadd.f32 %v556_v0, %v2415_v27  ;;  %v558_v2 = vpop.f32.mrb[13].mxu0 }
 0x10a   : > { %1914 = vrcp.f32 %v665_v62  ;;  %v559_v33 = vadd.f32 %v558_v2, %v2422_v37 }
 0x10b   : > { %v1901_v4 = vpop.eup %1900  ;;  %v1626_v6 = vmul.f32 -1.442695, %v557_v1  ;;  %1916 = vtanh.f32 %v541_v63 }
 0x10c   : > { %v2433_v7 = vpop.eup %1902  ;;  %v666_v8 = vadd.f32 1.0, %v1901_v4  ;;  %v562_v10 = vpop.f32.mrb[14].mxu0 }
 0x10d   : > { %1918 = vpow2.f32 %v1626_v6  ;;  %v563_v11 = vadd.f32 %v562_v10, %v2415_v27  ;;  %v564_v12 = vpop.f32.mrb[15].mxu0  ;;  %v727_v13 = vmul.f32 %v2433_v7, %v1899_v3  ;;  %v1905_v14 = vpop.eup %1904 }
 0x10e   : > { %1920 = vrcp.f32 %v666_v8  ;;  %v565_v44 = vadd.f32 %v564_v12, %v2422_v37 }
 0x10f   : > { %v1907_v15 = vpop.eup %1906  ;;  %v1627_v16 = vmul.f32 -1.442695, %v563_v11  ;;  %1922 = vtanh.f32 %v727_v13 }
 0x110   : > { %v2438_v17 = vpop.eup %1908  ;;  %v667_v18 = vadd.f32 1.0, %v1907_v15  ;;  %1924 = vtanh.f32 %v547_v9  ;;  %v568_v20 = vpop.f32.mrb[16].mxu0 }
 0x111   : > { %v728_v21 = vmul.f32 %v2438_v17, %v1905_v14  ;;  %1926 = vpow2.f32 %v1627_v16  ;;  %v569_v22 = vadd.f32 %v568_v20, %v2415_v27  ;;  %v570_v23 = vpop.f32.mrb[17].mxu0  ;;  %v1911_v26 = vpop.eup %1910 }
 0x112   : > { %1928 = vrcp.f32 %v667_v18  ;;  %v571_v55 = vadd.f32 %v570_v23, %v2422_v37 }
 0x113   : > { %v1913_v28 = vpop.eup %1912  ;;  %1930 = vtanh.f32 %v728_v21  ;;  %v1628_v29 = vmul.f32 -1.442695, %v569_v22 }
 0x114   : > { %v2443_v30 = vpop.eup %1914  ;;  %v668_v31 = vadd.f32 1.0, %v1913_v28  ;;  %1932 = vtanh.f32 %v553_v19  ;;  %v574_v34 = vpop.f32.mrb[18].mxu0 }
 0x115   : > { %1934 = vpow2.f32 %v1628_v29  ;;  %v575_v35 = vadd.f32 %v574_v34, %v2415_v27  ;;  %v576_v36 = vpop.f32.mrb[19].mxu0  ;;  %v729_v38 = vmul.f32 %v2443_v30, %v1911_v26  ;;  %v1917_v39 = vpop.eup %1916 }
 0x116   : > { %1936 = vrcp.f32 %v668_v31  ;;  %v577_v2 = vadd.f32 %v576_v36, %v2422_v37 }
 0x117   : > { %v1919_v40 = vpop.eup %1918  ;;  %v1629_v41 = vmul.f32 -1.442695, %v575_v35  ;;  %1938 = vtanh.f32 %v729_v38 }
 0x118   : > { %v2448_v42 = vpop.eup %1920  ;;  %v669_v43 = vadd.f32 1.0, %v1919_v40  ;;  %1940 = vtanh.f32 %v559_v33  ;;  %v580_v45 = vpop.f32.mrb[20].mxu0 }
 0x119   : > { %v1923_v46 = vpop.eup %1922  ;;  %v730_v47 = vmul.f32 %v2448_v42, %v1917_v39  ;;  %1942 = vpow2.f32 %v1629_v41  ;;  %v581_v48 = vadd.f32 %v580_v45, %v2415_v27  ;;  %v582_v49 = vpop.f32.mrb[21].mxu0 }
 0x11a   : > { %v1925_v50 = vpop.eup %1924  ;;  %1944 = vrcp.f32 %v669_v43  ;;  %775 = vrot.lane.b32.xlu0 %v1923_v46, %s2229_s22  ;;  %v583_v15 = vadd.f32 %v582_v49, %v2422_v37 }
 0x11b   : > { %v1927_v51 = vpop.eup %1926  ;;  %1946 = vtanh.f32 %v730_v47  ;;  %v1630_v52 = vmul.f32 -1.442695, %v581_v48 }
 0x11c   : > { %v2454_v53 = vpop.eup %1928  ;;  %v670_v54 = vadd.f32 1.0, %v1927_v51  ;;  %1948 = vtanh.f32 %v565_v44  ;;  %v586_v56 = vpop.f32.mrb[22].mxu0 }
 0x11d   : > { %v1931_v57 = vpop.eup %1930  ;;  %v731_v58 = vmul.f32 %v2454_v53, %v1925_v50  ;;  %1950 = vpow2.f32 %v1630_v52  ;;  %v587_v59 = vadd.f32 %v586_v56, %v2415_v27  ;;  %v588_v60 = vpop.f32.mrb[23].mxu0 }
 0x11e   : > { %v1933_v61 = vpop.eup %1932  ;;  %1952 = vrcp.f32 %v670_v54  ;;  %777 = vrot.lane.b32.xlu0 %v1931_v57, %s2229_s22  ;;  %v589_v31 = vadd.f32 %v588_v60, %v2422_v37 }
 0x11f   : > { %v1935_v62 = vpop.eup %1934  ;;  %1954 = vtanh.f32 %v731_v58  ;;  %v1631_v63 = vmul.f32 -1.442695, %v587_v59 }
 0x120   : > { %v2460_v0 = vpop.eup %1936  ;;  %v671_v1 = vadd.f32 1.0, %v1935_v62  ;;  %1956 = vtanh.f32 %v571_v55  ;;  %v592_v3 = vpop.f32.mrb[24].mxu0 }
 0x121   : > { %v1939_v4 = vpop.eup %1938  ;;  %v732_v6 = vmul.f32 %v2460_v0, %v1933_v61  ;;  %1958 = vpow2.f32 %v1631_v63  ;;  %v593_v8 = vadd.f32 %v592_v3, %v2415_v27  ;;  %v594_v9 = vpop.f32.mrb[25].mxu0 }
 0x122   : > { %v1941_v10 = vpop.eup %1940  ;;  %1960 = vrcp.f32 %v671_v1  ;;  %779 = vrot.lane.b32.xlu1 %v1939_v4, %s2229_s22  ;;  %v595_v45 = vadd.f32 %v594_v9, %v2422_v37 }
 0x123   : > { %v1943_v11 = vpop.eup %1942  ;;  %1962 = vtanh.f32 %v732_v6  ;;  %v1632_v12 = vmul.f32 -1.442695, %v593_v8 }
 0x124   : > { %v2466_v13 = vpop.eup %1944  ;;  %v672_v14 = vadd.f32 1.0, %v1943_v11  ;;  %1964 = vtanh.f32 %v577_v2  ;;  %v598_v16 = vpop.f32.mrb[26].mxu0 }
 0x125   : > { %v1947_v18 = vpop.eup %1946  ;;  %v733_v19 = vmul.f32 %v2466_v13, %v1941_v10  ;;  %1966 = vpow2.f32 %v1632_v12  ;;  %v599_v20 = vadd.f32 %v598_v16, %v2415_v27  ;;  %v600_v21 = vpop.f32.mrb[27].mxu0 }
 0x126   : > { %v1949_v22 = vpop.eup %1948  ;;  %1968 = vrcp.f32 %v672_v14  ;;  %781 = vrot.lane.b32.xlu1 %v1947_v18, %s2229_s22  ;;  %v601_v59 = vadd.f32 %v600_v21, %v2422_v37 }
 0x127   : > { %v1951_v23 = vpop.eup %1950  ;;  %1970 = vtanh.f32 %v733_v19  ;;  %v1633_v26 = vmul.f32 -1.442695, %v599_v20 }
 0x128   : > { %v2472_v28 = vpop.eup %1952  ;;  %v673_v29 = vadd.f32 1.0, %v1951_v23  ;;  %1972 = vtanh.f32 %v583_v15  ;;  %v604_v33 = vpop.f32.mrb[28].mxu0 }
 0x129   : > { %v1955_v34 = vpop.eup %1954  ;;  %v734_v35 = vmul.f32 %v2472_v28, %v1949_v22  ;;  %1974 = vpow2.f32 %v1633_v26  ;;  %v605_v36 = vadd.f32 %v604_v33, %v2415_v27  ;;  %v606_v38 = vpop.f32.mrb[29].mxu0 }
 0x12a   : > { %v1957_v39 = vpop.eup %1956  ;;  %1976 = vrcp.f32 %v673_v29  ;;  %783 = vrot.lane.b32.xlu0 %v1955_v34, %s2229_s22  ;;  %v607_v2 = vadd.f32 %v606_v38, %v2422_v37  ;;  %v840_v38 = vld [vmem:[%s2854_s6 + $0x8] sm:$0xff] }
 0x12b   : > { %v1959_v40 = vpop.eup %1958  ;;  %1978 = vtanh.f32 %v734_v35  ;;  %v1634_v41 = vmul.f32 -1.442695, %v605_v36 }
 0x12c   : > { %v2478_v43 = vpop.eup %1960  ;;  %v674_v44 = vadd.f32 1.0, %v1959_v40  ;;  %1980 = vtanh.f32 %v589_v31  ;;  %v610_v46 = vpop.f32.mrb[30].mxu0  ;;  %v839_v40 = vld [vmem:[%s2854_s6] sm:$0xff] }
 0x12d   : > { %v1963_v47 = vpop.eup %1962  ;;  %v735_v48 = vmul.f32 %v2478_v43, %v1957_v39  ;;  %1982 = vpow2.f32 %v1634_v41  ;;  %v611_v49 = vadd.f32 %v610_v46, %v2415_v27  ;;  %v612_v50 = vpop.f32.mrb[31].mxu0  ;;  %v842_v39 = vld [vmem:[%s2854_s6 + $0x18] sm:$0xff] }
 0x12e   : > { %v1965_v51 = vpop.eup %1964  ;;  %1984 = vrcp.f32 %v674_v44  ;;  %785 = vrot.lane.b32.xlu1 %v1963_v47, %s2229_s22  ;;  %v613_v11 = vadd.f32 %v612_v50, %v2422_v37  ;;  %v1745_v41 = vpack.c.bf16 %v842_v39, %v840_v38  ;;  %v841_v44 = vld [vmem:[%s2854_s6 + $0x10] sm:$0xff]  ;;  %v846_v46 = vld [vmem:[%s2854_s6 + $0x38] sm:$0xff]  ;;  %v843_v50 = vld [vmem:[%s2854_s6 + $0x20] sm:$0xff] }
 0x12f   : > { %v1967_v52 = vpop.eup %1966  ;;  %1986 = vtanh.f32 %v735_v48  ;;  %v1635_v54 = vmul.f32 -1.442695, %v611_v49  ;;  %v1747_v48 = vpack.c.bf16 %v841_v44, %v839_v40 }
 0x130   : > { %v2484_v55 = vpop.eup %1968  ;;  %v675_v56 = vadd.f32 1.0, %v1967_v52  ;;  %1988 = vtanh.f32 %v595_v45  ;;  %v844_v45 = vld [vmem:[%s2854_s6 + $0x28] sm:$0xff]  ;;  %1746 = vmatprep.subr.bf16.mxu1 %v1745_v41 }
 0x131   : > { %v1971_v57 = vpop.eup %1970  ;;  %v736_v58 = vmul.f32 %v2484_v55, %v1965_v51  ;;  %1990 = vpow2.f32 %v1635_v54  ;;  %v1749_v49 = vpack.c.bf16 %v846_v46, %v844_v45  ;;  %v845_v51 = vld [vmem:[%s2854_s6 + $0x30] sm:$0xff]  ;;  %v848_v52 = vld [vmem:[%s2854_s6 + $0x48] sm:$0xff]  ;;  %v850_v54 = vld [vmem:[%s2854_s6 + $0x58] sm:$0xff]  ;;  %1748 = vmatpush1.bf16.msra.mxu1 %v1747_v48 }
 0x132   : > { %v1973_v60 = vpop.eup %1972  ;;  %1992 = vrcp.f32 %v675_v56  ;;  %787 = vrot.lane.b32.xlu0 %v1971_v57, %s2229_s22  ;;  %v1751_v56 = vpack.c.bf16 %v845_v51, %v843_v50  ;;  %v1753_v57 = vpack.c.bf16 %v850_v54, %v848_v52 }
 0x133   : > { %v1975_v27 = vpop.eup %1974  ;;  %1994 = vtanh.f32 %v736_v58  ;;  %1750 = vmatprep.subr.bf16.mxu1 %v1749_v49  ;;  %v847_v58 = vld [vmem:[%s2854_s6 + $0x40] sm:$0xff] }
 0x134   : > { %v2489_v61 = vpop.eup %1976  ;;  %v676_v62 = vadd.f32 1.0, %v1975_v27  ;;  %1996 = vtanh.f32 %v601_v59  ;;  %v849_v59 = vld [vmem:[%s2854_s6 + $0x50] sm:$0xff]  ;;  %v852_v27 = vld [vmem:[%s2854_s6 + $0x68] sm:$0xff] }
 0x135   : > { %v1979_v63 = vpop.eup %1978  ;;  %v737_v1 = vmul.f32 %v2489_v61, %v1973_v60  ;;  %1752 = vmatpush1.bf16.msra.mxu1 %v1751_v56 }
 0x136   : > { %v1981_v3 = vpop.eup %1980  ;;  %1998 = vrcp.f32 %v676_v62  ;;  %789 = vrot.lane.b32.xlu1 %v1979_v63, %s2229_s22  ;;  %v854_v62 = vld [vmem:[%s2854_s6 + $0x78] sm:$0xff]  ;;  %v1755_v63 = vpack.c.bf16 %v849_v59, %v847_v58  ;;  %1754 = vmatprep.subr.bf16.mxu1 %v1753_v57  ;;  %v855_v57 = vld [vmem:[%s2855_s7] sm:$0x3] }
 0x137   : > { %v1983_v4 = vpop.eup %1982  ;;  %2000 = vtanh.f32 %v737_v1  ;;  %v1757_v1 = vpack.c.bf16 %v854_v62, %v852_v27  ;;  %v2634_v58 = vrot.slane %v855_v57, %v397_v25 }
 0x138   : > { %v2494_v6 = vpop.eup %1984  ;;  %v677_v8 = vadd.f32 1.0, %v1983_v4  ;;  %2002 = vtanh.f32 %v607_v2  ;;  %v851_v2 = vld [vmem:[%s2854_s6 + $0x60] sm:$0xff] }
 0x139   : > { %v1987_v9 = vpop.eup %1986  ;;  %v738_v10 = vmul.f32 %v2494_v6, %v1981_v3  ;;  %v853_v3 = vld [vmem:[%s2854_s6 + $0x70] sm:$0xff]  ;;  %1756 = vmatpush1.bf16.msra.mxu1 %v1755_v63 }
 0x13a   : > { %v1989_v12 = vpop.eup %1988  ;;  %2004 = vrcp.f32 %v677_v8  ;;  %791 = vrot.lane.b32.xlu0 %v1987_v9, %s2229_s22  ;;  %v1759_v8 = vpack.c.bf16 %v853_v3, %v851_v2  ;;  %1758 = vmatprep.subr.bf16.mxu1 %v1757_v1 }
 0x13b   : > { %v1991_v14 = vpop.eup %1990  ;;  %2006 = vtanh.f32 %v738_v10 }
 0x13c   : > { %v2499_v15 = vpop.eup %1992  ;;  %v678_v16 = vadd.f32 1.0, %v1991_v14  ;;  %2008 = vtanh.f32 %v613_v11 }
 0x13d   : > { %v1995_v18 = vpop.eup %1994  ;;  %v739_v19 = vmul.f32 %v2499_v15, %v1989_v12  ;;  %1760 = vmatpush1.bf16.msra.mxu1 %v1759_v8 }
 0x13e   : > { %2010 = vrcp.f32 %v678_v16  ;;  %793 = vrot.lane.b32.xlu1 %v1995_v18, %s2229_s22  ;;  %v1997_v20 = vpop.eup %1996 }
 0x13f   : > { %2012 = vtanh.f32 %v739_v19 }
 0x140   : > { %v2503_v21 = vpop.eup %1998 }
 0x141   : > { %v2001_v37 = vpop.eup %2000  ;;  %v740_v22 = vmul.f32 %v2503_v21, %v1997_v20 }
 0x142   : > { %795 = vrot.lane.b32.xlu0 %v2001_v37, %s2229_s22  ;;  %v2003_v23 = vpop.eup %2002 }
 0x143   : > { %2014 = vtanh.f32 %v740_v22 }
 0x144   : > { %v2507_v26 = vpop.eup %2004 }
 0x145   : > { %v2007_v29 = vpop.eup %2006  ;;  %v741_v31 = vmul.f32 %v2507_v26, %v2003_v23 }
 0x146   : > { %797 = vrot.lane.b32.xlu1 %v2007_v29, %s2229_s22  ;;  %v2009_v33 = vpop.eup %2008 }
 0x147   : > { %2016 = vtanh.f32 %v741_v31 }
 0x148   : > { %v2511_v34 = vpop.eup %2010 }
 0x149   : > { %v2013_v35 = vpop.eup %2012  ;;  %v742_v36 = vmul.f32 %v2511_v34, %v2009_v33 }
 0x14a   : > { %799 = vrot.lane.b32.xlu0 %v2013_v35, %s2229_s22 }
 0x14b   : > { %2018 = vtanh.f32 %v742_v36 }
 0x14d   : > { %v2015_v47 = vpop.eup %2014 }
 0x14e   : > { %801 = vrot.lane.b32.xlu1 %v2015_v47, %s2229_s22 }
 0x151   : > { %v2017_v60 = vpop.eup %2016 }
 0x152   : > { %803 = vrot.lane.b32.xlu0 %v2017_v60, %s2229_s22 }
 0x155   : > { %v2019_v4 = vpop.eup %2018 }
 0x156   : > { %805 = vrot.lane.b32.xlu1 %v2019_v4, %s2229_s22  ;;  %v2640_v4 = vrot.slane %v855_v57, %v401_v32 }
 0x18c   : > { %v776_v9 = vpop.permute.xlu0 %775 }
 0x18d   : > { %v823_v10 = vmul.f32 %v2433_v7, %v776_v9 }
 0x18f   : > { %883 = vrot.lane.b32.xlu0 %v823_v10, %s2229_s22 }
 0x190   : > { %v778_v11 = vpop.permute.xlu0 %777 }
 0x191   : > { %v824_v12 = vmul.f32 %v2438_v17, %v778_v11 }
 0x193   : > { %885 = vrot.lane.b32.xlu1 %v824_v12, %s2229_s22 }
 0x194   : > { %v780_v14 = vpop.permute.xlu1 %779 }
 0x195   : > { %v825_v16 = vmul.f32 %v2443_v30, %v780_v14 }
 0x197   : > { %887 = vrot.lane.b32.xlu0 %v825_v16, %s2229_s22 }
 0x198   : > { %v782_v18 = vpop.permute.xlu1 %781 }
 0x199   : > { %v826_v19 = vmul.f32 %v2448_v42, %v782_v18 }
 0x19b   : > { %889 = vrot.lane.b32.xlu1 %v826_v19, %s2229_s22 }
 0x19c   : > { %v784_v20 = vpop.permute.xlu0 %783 }
 0x19d   : > { %v827_v7 = vmul.f32 %v2454_v53, %v784_v20 }
 0x19f   : > { %891 = vrot.lane.b32.xlu0 %v827_v7, %s2229_s22 }
 0x1a0   : > { %v786_v37 = vpop.permute.xlu1 %785 }
 0x1a1   : > { %v828_v17 = vmul.f32 %v2460_v0, %v786_v37 }
 0x1a3   : > { %893 = vrot.lane.b32.xlu1 %v828_v17, %s2229_s22 }
 0x1a4   : > { %v788_v22 = vpop.permute.xlu0 %787 }
 0x1a5   : > { %v829_v30 = vmul.f32 %v2466_v13, %v788_v22 }
 0x1a7   : > { %895 = vrot.lane.b32.xlu0 %v829_v30, %s2229_s22 }
 0x1a8   : > { %v790_v23 = vpop.permute.xlu1 %789 }
 0x1a9   : > { %v830_v42 = vmul.f32 %v2472_v28, %v790_v23 }
 0x1ab   : > { %897 = vrot.lane.b32.xlu1 %v830_v42, %s2229_s22 }
 0x1ac   : > { %v792_v29 = vpop.permute.xlu0 %791 }
 0x1ad   : > { %v831_v53 = vmul.f32 %v2478_v43, %v792_v29 }
 0x1af   : > { %899 = vrot.lane.b32.xlu0 %v831_v53, %s2229_s22 }
 0x1b0   : > { %v794_v31 = vpop.permute.xlu1 %793 }
 0x1b1   : > { %v832_v0 = vmul.f32 %v2484_v55, %v794_v31 }
 0x1b3   : > { %901 = vrot.lane.b32.xlu1 %v832_v0, %s2229_s22 }
 0x1b4   : > { %v796_v33 = vpop.permute.xlu0 %795 }
 0x1b5   : > { %v833_v13 = vmul.f32 %v2489_v61, %v796_v33 }
 0x1b7   : > { %903 = vrot.lane.b32.xlu0 %v833_v13, %s2229_s22 }
 0x1b8   : > { %v798_v35 = vpop.permute.xlu1 %797 }
 0x1b9   : > { %v834_v28 = vmul.f32 %v2494_v6, %v798_v35 }
 0x1bb   : > { %905 = vrot.lane.b32.xlu1 %v834_v28, %s2229_s22 }
 0x1bc   : > { %v800_v36 = vpop.permute.xlu0 %799 }
 0x1bd   : > { %v835_v43 = vmul.f32 %v2499_v15, %v800_v36 }
 0x1bf   : > { %907 = vrot.lane.b32.xlu0 %v835_v43, %s2229_s22 }
 0x1c0   : > { %v802_v38 = vpop.permute.xlu1 %801 }
 0x1c1   : > { %v836_v55 = vmul.f32 %v2503_v21, %v802_v38 }
 0x1c3   : > { %909 = vrot.lane.b32.xlu1 %v836_v55, %s2229_s22 }
 0x1c4   : > { %v804_v39 = vpop.permute.xlu0 %803 }
 0x1c5   : > { %v837_v61 = vmul.f32 %v2507_v26, %v804_v39 }
 0x1c7   : > { %911 = vrot.lane.b32.xlu0 %v837_v61, %s2229_s22 }
 0x1c8   : > { %v806_v40 = vpop.permute.xlu1 %805 }
 0x1c9   : > { %v838_v6 = vmul.f32 %v2511_v34, %v806_v40 }
 0x1cb   : > { %913 = vrot.lane.b32.xlu1 %v838_v6, %s2229_s22 }
 0x201   : > { %v884_v41 = vpop.permute.xlu0 %883 }
 0x202   : > { %1636 = vmatmul.mubr.msk.f32.vlgmr.msra.gmra.mrb[0].mxu1 %vm915_vm1, %v884_v41 }
 0x203   : > { %1018 = vmatprep.mubr.f32.mxu1 %v2228_v5 }
 0x205   : > { %v886_v15 = vpop.permute.xlu1 %885 }
 0x206   : > { %1637 = vmatmul.mubr.msk.f32.gmra.mrb[2].mxu1 %vm915_vm1, %v886_v15 }
 0x207   : > { %1024 = vmatprep.mubr.f32.mxu1 %v2228_v5 }
 0x209   : > { %v888_v21 = vpop.permute.xlu0 %887 }
 0x20a   : > { %1638 = vmatmul.mubr.msk.f32.gmra.mrb[4].mxu1 %vm915_vm1, %v888_v21 }
 0x20b   : > { %1030 = vmatprep.mubr.f32.mxu1 %v2228_v5 }
 0x20d   : > { %v890_v26 = vpop.permute.xlu1 %889 }
 0x20e   : > { %1639 = vmatmul.mubr.msk.f32.gmra.mrb[6].mxu1 %vm915_vm1, %v890_v26 }
 0x20f   : > { %1036 = vmatprep.mubr.f32.mxu1 %v2228_v5 }
 0x211   : > { %v892_v34 = vpop.permute.xlu0 %891 }
 0x212   : > { %1640 = vmatmul.mubr.msk.f32.gmra.mrb[8].mxu1 %vm915_vm1, %v892_v34 }
 0x213   : > { %1042 = vmatprep.mubr.f32.mxu1 %v2228_v5 }
 0x215   : > { %v894_v44 = vpop.permute.xlu1 %893 }
 0x216   : > { %1641 = vmatmul.mubr.msk.f32.gmra.mrb[10].mxu1 %vm915_vm1, %v894_v44 }
 0x217   : > { %1048 = vmatprep.mubr.f32.mxu1 %v2228_v5 }
 0x219   : > { %v896_v45 = vpop.permute.xlu0 %895 }
 0x21a   : > { %1642 = vmatmul.mubr.msk.f32.gmra.mrb[12].mxu1 %vm915_vm1, %v896_v45 }
 0x21b   : > { %1054 = vmatprep.mubr.f32.mxu1 %v2228_v5 }
 0x21d   : > { %v898_v46 = vpop.permute.xlu1 %897 }
 0x21e   : > { %1643 = vmatmul.mubr.msk.f32.gmra.mrb[14].mxu1 %vm915_vm1, %v898_v46 }
 0x21f   : > { %1060 = vmatprep.mubr.f32.mxu1 %v2228_v5 }
 0x221   : > { %v900_v47 = vpop.permute.xlu0 %899 }
 0x222   : > { %1644 = vmatmul.mubr.msk.f32.gmra.mrb[16].mxu1 %vm915_vm1, %v900_v47 }
 0x223   : > { %1066 = vmatprep.mubr.f32.mxu1 %v2228_v5 }
 0x225   : > { %v902_v48 = vpop.permute.xlu1 %901 }
 0x226   : > { %1645 = vmatmul.mubr.msk.f32.gmra.mrb[18].mxu1 %vm915_vm1, %v902_v48 }
 0x227   : > { %1072 = vmatprep.mubr.f32.mxu1 %v2228_v5 }
 0x229   : > { %v904_v49 = vpop.permute.xlu0 %903 }
 0x22a   : > { %1646 = vmatmul.mubr.msk.f32.gmra.mrb[20].mxu1 %vm915_vm1, %v904_v49 }
 0x22b   : > { %1078 = vmatprep.mubr.f32.mxu1 %v2228_v5 }
 0x22d   : > { %v906_v50 = vpop.permute.xlu1 %905 }
 0x22e   : > { %1647 = vmatmul.mubr.msk.f32.gmra.mrb[22].mxu1 %vm915_vm1, %v906_v50 }
 0x22f   : > { %1084 = vmatprep.mubr.f32.mxu1 %v2228_v5 }
 0x231   : > { %v908_v51 = vpop.permute.xlu0 %907 }
 0x232   : > { %1648 = vmatmul.mubr.msk.f32.gmra.mrb[24].mxu1 %vm915_vm1, %v908_v51 }
 0x233   : > { %1090 = vmatprep.mubr.f32.mxu1 %v2228_v5 }
 0x235   : > { %v910_v52 = vpop.permute.xlu1 %909 }
 0x236   : > { %1649 = vmatmul.mubr.msk.f32.gmra.mrb[26].mxu1 %vm915_vm1, %v910_v52 }
 0x237   : > { %1096 = vmatprep.mubr.f32.mxu1 %v2228_v5 }
 0x239   : > { %v912_v54 = vpop.permute.xlu0 %911 }
 0x23a   : > { %1650 = vmatmul.mubr.msk.f32.gmra.mrb[28].mxu1 %vm915_vm1, %v912_v54 }
 0x23b   : > { %1102 = vmatprep.mubr.f32.mxu1 %v2228_v5 }
 0x23d   : > { %v914_v56 = vpop.permute.xlu1 %913 }
 0x23e   : > { %1651 = vmatmul.mubr.msk.f32.gmra.mrb[30].mxu1 %vm915_vm1, %v914_v56 }
 0x2d5   : > { %v1014_v59 = vpop.f32.mrb[0].mxu1 }
 0x2d6   : > { %v1015_v60 = vadd.f32 %v1014_v59, %v2634_v58  ;;  %v1016_v27 = vpop.f32.mrb[1].mxu1 }
 0x2d7   : > { %v1017_v11 = vadd.f32 %v1016_v27, %v2640_v4 }
 0x2d8   : > { %v1652_v62 = vmul.f32 -1.442695, %v1015_v60 }
 0x2d9   : > { %v1020_v63 = vpop.f32.mrb[2].mxu1 }
 0x2da   : > { %2020 = vpow2.f32 %v1652_v62  ;;  %v1021_v1 = vadd.f32 %v1020_v63, %v2634_v58  ;;  %v1022_v2 = vpop.f32.mrb[3].mxu1 }
 0x2db   : > { %v1023_v24 = vadd.f32 %v1022_v2, %v2640_v4 }
 0x2dc   : > { %v1653_v3 = vmul.f32 -1.442695, %v1021_v1 }
 0x2dd   : > { %v1026_v8 = vpop.f32.mrb[4].mxu1 }
 0x2de   : > { %2022 = vpow2.f32 %v1653_v3  ;;  %v1027_v25 = vadd.f32 %v1026_v8, %v2634_v58  ;;  %v1028_v9 = vpop.f32.mrb[5].mxu1 }
 0x2df   : > { %v1029_v23 = vadd.f32 %v1028_v9, %v2640_v4 }
 0x2e0   : > { %v1654_v10 = vmul.f32 -1.442695, %v1027_v25 }
 0x2e1   : > { %v1032_v12 = vpop.f32.mrb[6].mxu1 }
 0x2e2   : > { %2024 = vpow2.f32 %v1654_v10  ;;  %v1033_v14 = vadd.f32 %v1032_v12, %v2634_v58  ;;  %v1034_v16 = vpop.f32.mrb[7].mxu1 }
 0x2e3   : > { %2026 = vtanh.f32 %v1017_v11  ;;  %v1035_v13 = vadd.f32 %v1034_v16, %v2640_v4 }
 0x2e4   : > { %v2021_v18 = vpop.eup %2020  ;;  %v1655_v19 = vmul.f32 -1.442695, %v1033_v14 }
 0x2e5   : > { %v1157_v20 = vadd.f32 1.0, %v2021_v18  ;;  %v1038_v32 = vpop.f32.mrb[8].mxu1 }
 0x2e6   : > { %2028 = vpow2.f32 %v1655_v19  ;;  %v1039_v7 = vadd.f32 %v1038_v32, %v2634_v58  ;;  %v1040_v37 = vpop.f32.mrb[9].mxu1 }
 0x2e7   : > { %2030 = vrcp.f32 %v1157_v20  ;;  %v1041_v40 = vadd.f32 %v1040_v37, %v2640_v4 }
 0x2e8   : > { %v2023_v17 = vpop.eup %2022  ;;  %v1656_v22 = vmul.f32 -1.442695, %v1039_v7  ;;  %2032 = vtanh.f32 %v1023_v24 }
 0x2e9   : > { %v1158_v30 = vadd.f32 1.0, %v2023_v17  ;;  %v1044_v42 = vpop.f32.mrb[10].mxu1 }
 0x2ea   : > { %2034 = vpow2.f32 %v1656_v22  ;;  %v1045_v29 = vadd.f32 %v1044_v42, %v2634_v58  ;;  %v1046_v53 = vpop.f32.mrb[11].mxu1 }
 0x2eb   : > { %2036 = vrcp.f32 %v1158_v30  ;;  %v1047_v47 = vadd.f32 %v1046_v53, %v2640_v4 }
 0x2ec   : > { %v2025_v31 = vpop.eup %2024  ;;  %v1657_v0 = vmul.f32 -1.442695, %v1045_v29  ;;  %2038 = vtanh.f32 %v1029_v23 }
 0x2ed   : > { %v1159_v33 = vadd.f32 1.0, %v2025_v31  ;;  %v1050_v35 = vpop.f32.mrb[12].mxu1  ;;  %v2027_v43 = vpop.eup %2026 }
 0x2ee   : > { %2040 = vpow2.f32 %v1657_v0  ;;  %v1051_v28 = vadd.f32 %v1050_v35, %v2634_v58  ;;  %v1052_v36 = vpop.f32.mrb[13].mxu1 }
 0x2ef   : > { %2042 = vrcp.f32 %v1159_v33  ;;  %v1053_v60 = vadd.f32 %v1052_v36, %v2640_v4 }
 0x2f0   : > { %v2029_v38 = vpop.eup %2028  ;;  %v1658_v55 = vmul.f32 -1.442695, %v1051_v28  ;;  %2044 = vtanh.f32 %v1035_v13 }
 0x2f1   : > { %v2651_v39 = vpop.eup %2030  ;;  %v1160_v61 = vadd.f32 1.0, %v2029_v38  ;;  %v1056_v6 = vpop.f32.mrb[14].mxu1 }
 0x2f2   : > { %v1221_v41 = vmul.f32 %v2651_v39, %v2027_v43  ;;  %2046 = vpow2.f32 %v1658_v55  ;;  %v1057_v15 = vadd.f32 %v1056_v6, %v2634_v58  ;;  %v1058_v21 = vpop.f32.mrb[15].mxu1  ;;  %v2033_v26 = vpop.eup %2032 }
 0x2f3   : > { %2048 = vrcp.f32 %v1160_v61  ;;  %v1059_v10 = vadd.f32 %v1058_v21, %v2640_v4 }
 0x2f4   : > { %v2035_v34 = vpop.eup %2034  ;;  %2050 = vtanh.f32 %v1221_v41  ;;  %v1659_v44 = vmul.f32 -1.442695, %v1057_v15 }
 0x2f5   : > { %v2656_v45 = vpop.eup %2036  ;;  %v1161_v46 = vadd.f32 1.0, %v2035_v34  ;;  %2052 = vtanh.f32 %v1041_v40  ;;  %v1062_v48 = vpop.f32.mrb[16].mxu1 }
 0x2f6   : > { %v1222_v49 = vmul.f32 %v2656_v45, %v2033_v26  ;;  %2054 = vpow2.f32 %v1659_v44  ;;  %v1063_v50 = vadd.f32 %v1062_v48, %v2634_v58  ;;  %v1064_v51 = vpop.f32.mrb[17].mxu1  ;;  %v2039_v52 = vpop.eup %2038 }
 0x2f7   : > { %2056 = vrcp.f32 %v1161_v46  ;;  %v1065_v37 = vadd.f32 %v1064_v51, %v2640_v4 }
 0x2f8   : > { %v2041_v54 = vpop.eup %2040  ;;  %2058 = vtanh.f32 %v1222_v49  ;;  %v1660_v56 = vmul.f32 -1.442695, %v1063_v50 }
 0x2f9   : > { %v2661_v57 = vpop.eup %2042  ;;  %v1162_v59 = vadd.f32 1.0, %v2041_v54  ;;  %2060 = vtanh.f32 %v1047_v47  ;;  %v1068_v27 = vpop.f32.mrb[18].mxu1 }
 0x2fa   : > { %v1223_v62 = vmul.f32 %v2661_v57, %v2039_v52  ;;  %2062 = vpow2.f32 %v1660_v56  ;;  %v1069_v63 = vadd.f32 %v1068_v27, %v2634_v58  ;;  %v1070_v1 = vpop.f32.mrb[19].mxu1  ;;  %v2045_v2 = vpop.eup %2044 }
 0x2fb   : > { %2064 = vrcp.f32 %v1162_v59  ;;  %v1071_v13 = vadd.f32 %v1070_v1, %v2640_v4 }
 0x2fc   : > { %v2047_v3 = vpop.eup %2046  ;;  %2066 = vtanh.f32 %v1223_v62  ;;  %v1661_v8 = vmul.f32 -1.442695, %v1069_v63 }
 0x2fd   : > { %v2666_v25 = vpop.eup %2048  ;;  %v1163_v9 = vadd.f32 1.0, %v2047_v3  ;;  %2068 = vtanh.f32 %v1053_v60  ;;  %v1074_v11 = vpop.f32.mrb[20].mxu1 }
 0x2fe   : > { %v2051_v12 = vpop.eup %2050  ;;  %v1224_v14 = vmul.f32 %v2666_v25, %v2045_v2  ;;  %2070 = vpow2.f32 %v1661_v8  ;;  %v1075_v16 = vadd.f32 %v1074_v11, %v2634_v58  ;;  %v1076_v18 = vpop.f32.mrb[21].mxu1 }
 0x2ff   : > { %v2053_v19 = vpop.eup %2052  ;;  %2072 = vrcp.f32 %v1163_v9  ;;  %1269 = vrot.lane.b32.xlu0 %v2051_v12, %s2229_s22  ;;  %v1077_v15 = vadd.f32 %v1076_v18, %v2640_v4 }
 0x300   : > { %v2055_v20 = vpop.eup %2054  ;;  %2074 = vtanh.f32 %v1224_v14  ;;  %v1662_v24 = vmul.f32 -1.442695, %v1075_v16 }
 0x301   : > { %v2672_v32 = vpop.eup %2056  ;;  %v1164_v7 = vadd.f32 1.0, %v2055_v20  ;;  %2076 = vtanh.f32 %v1059_v10  ;;  %v1080_v17 = vpop.f32.mrb[22].mxu1 }
 0x302   : > { %v2059_v22 = vpop.eup %2058  ;;  %v1225_v30 = vmul.f32 %v2672_v32, %v2053_v19  ;;  %2078 = vpow2.f32 %v1662_v24  ;;  %v1081_v23 = vadd.f32 %v1080_v17, %v2634_v58  ;;  %v1082_v42 = vpop.f32.mrb[23].mxu1 }
 0x303   : > { %v2061_v29 = vpop.eup %2060  ;;  %2080 = vrcp.f32 %v1164_v7  ;;  %1271 = vrot.lane.b32.xlu1 %v2059_v22, %s2229_s22  ;;  %v1083_v52 = vadd.f32 %v1082_v42, %v2640_v4 }
 0x304   : > { %v2063_v53 = vpop.eup %2062  ;;  %2082 = vtanh.f32 %v1225_v30  ;;  %v1663_v31 = vmul.f32 -1.442695, %v1081_v23 }
 0x305   : > { %v2678_v0 = vpop.eup %2064  ;;  %v1165_v33 = vadd.f32 1.0, %v2063_v53  ;;  %2084 = vtanh.f32 %v1065_v37  ;;  %v1086_v35 = vpop.f32.mrb[24].mxu1 }
 0x306   : > { %v2067_v28 = vpop.eup %2066  ;;  %v1226_v36 = vmul.f32 %v2678_v0, %v2061_v29  ;;  %2086 = vpow2.f32 %v1663_v31  ;;  %v1087_v43 = vadd.f32 %v1086_v35, %v2634_v58  ;;  %v1088_v38 = vpop.f32.mrb[25].mxu1 }
 0x307   : > { %v2069_v55 = vpop.eup %2068  ;;  %2088 = vrcp.f32 %v1165_v33  ;;  %1273 = vrot.lane.b32.xlu0 %v2067_v28, %s2229_s22  ;;  %v1089_v8 = vadd.f32 %v1088_v38, %v2640_v4 }
 0x308   : > { %v2071_v61 = vpop.eup %2070  ;;  %2090 = vtanh.f32 %v1226_v36  ;;  %v1664_v40 = vmul.f32 -1.442695, %v1087_v43 }
 0x309   : > { %v2684_v6 = vpop.eup %2072  ;;  %v1166_v41 = vadd.f32 1.0, %v2071_v61  ;;  %2092 = vtanh.f32 %v1071_v13  ;;  %v1092_v21 = vpop.f32.mrb[26].mxu1 }
 0x30a   : > { %v2075_v26 = vpop.eup %2074  ;;  %v1227_v34 = vmul.f32 %v2684_v6, %v2069_v55  ;;  %2094 = vpow2.f32 %v1664_v40  ;;  %v1093_v44 = vadd.f32 %v1092_v21, %v2634_v58  ;;  %v1094_v46 = vpop.f32.mrb[27].mxu1 }
 0x30b   : > { %v2077_v47 = vpop.eup %2076  ;;  %2096 = vrcp.f32 %v1166_v41  ;;  %1275 = vrot.lane.b32.xlu1 %v2075_v26, %s2229_s22  ;;  %v1095_v17 = vadd.f32 %v1094_v46, %v2640_v4 }
 0x30c   : > { %v2079_v48 = vpop.eup %2078  ;;  %2098 = vtanh.f32 %v1227_v34  ;;  %v1665_v49 = vmul.f32 -1.442695, %v1093_v44 }
 0x30d   : > { %v2690_v50 = vpop.eup %2080  ;;  %v1167_v51 = vadd.f32 1.0, %v2079_v48  ;;  %2100 = vtanh.f32 %v1077_v15  ;;  %v1098_v54 = vpop.f32.mrb[28].mxu1 }
 0x30e   : > { %v2083_v56 = vpop.eup %2082  ;;  %v1228_v59 = vmul.f32 %v2690_v50, %v2077_v47  ;;  %2102 = vpow2.f32 %v1665_v49  ;;  %v1099_v60 = vadd.f32 %v1098_v54, %v2634_v58  ;;  %v1100_v27 = vpop.f32.mrb[29].mxu1 }
 0x30f   : > { %v2085_v62 = vpop.eup %2084  ;;  %2104 = vrcp.f32 %v1167_v51  ;;  %1277 = vrot.lane.b32.xlu0 %v2083_v56, %s2229_s22  ;;  %v1101_v53 = vadd.f32 %v1100_v27, %v2640_v4  ;;  %v2230_v27 = vmov 0.0|0.0  }
 0x310   : > { %v2087_v63 = vpop.eup %2086  ;;  %2106 = vtanh.f32 %v1228_v59  ;;  %v1666_v1 = vmul.f32 -1.442695, %v1099_v60  ;;  %1761 = vmatprep.subr.bf16.mxu0 %v2230_v27 }
 0x311   : > { %v2696_v2 = vpop.eup %2088  ;;  %v1168_v3 = vadd.f32 1.0, %v2087_v63  ;;  %2108 = vtanh.f32 %v1083_v52  ;;  %v1104_v9 = vpop.f32.mrb[30].mxu1 }
 0x312   : > { %v2091_v10 = vpop.eup %2090  ;;  %v1229_v11 = vmul.f32 %v2696_v2, %v2085_v62  ;;  %2110 = vpow2.f32 %v1666_v1  ;;  %v1105_v12 = vadd.f32 %v1104_v9, %v2634_v58  ;;  %v1106_v14 = vpop.f32.mrb[31].mxu1 }
 0x313   : > { %v2093_v16 = vpop.eup %2092  ;;  %2112 = vrcp.f32 %v1168_v3  ;;  %1279 = vrot.lane.b32.xlu1 %v2091_v10, %s2229_s22  ;;  %v1107_v43 = vadd.f32 %v1106_v14, %v2640_v4 }
 0x314   : > { %v2095_v18 = vpop.eup %2094  ;;  %2114 = vtanh.f32 %v1229_v11  ;;  %v1667_v19 = vmul.f32 -1.442695, %v1105_v12 }
 0x315   : > { %v2702_v20 = vpop.eup %2096  ;;  %v1169_v24 = vadd.f32 1.0, %v2095_v18  ;;  %2116 = vtanh.f32 %v1089_v8 }
 0x316   : > { %v2099_v7 = vpop.eup %2098  ;;  %v1230_v37 = vmul.f32 %v2702_v20, %v2093_v16  ;;  %2118 = vpow2.f32 %v1667_v19 }
 0x317   : > { %v2101_v22 = vpop.eup %2100  ;;  %2120 = vrcp.f32 %v1169_v24  ;;  %1281 = vrot.lane.b32.xlu0 %v2099_v7, %s2229_s22 }
 0x318   : > { %v2103_v58 = vpop.eup %2102  ;;  %2122 = vtanh.f32 %v1230_v37 }
 0x319   : > { %v2707_v30 = vpop.eup %2104  ;;  %v1170_v23 = vadd.f32 1.0, %v2103_v58  ;;  %2124 = vtanh.f32 %v1095_v17 }
 0x31a   : > { %v2107_v42 = vpop.eup %2106  ;;  %v1231_v29 = vmul.f32 %v2707_v30, %v2101_v22 }
 0x31b   : > { %v2109_v31 = vpop.eup %2108  ;;  %2126 = vrcp.f32 %v1170_v23  ;;  %1283 = vrot.lane.b32.xlu1 %v2107_v42, %s2229_s22 }
 0x31c   : > { %v2111_v33 = vpop.eup %2110  ;;  %2128 = vtanh.f32 %v1231_v29 }
 0x31d   : > { %v2712_v13 = vpop.eup %2112  ;;  %v1171_v35 = vadd.f32 1.0, %v2111_v33  ;;  %2130 = vtanh.f32 %v1101_v53 }
 0x31e   : > { %v2115_v28 = vpop.eup %2114  ;;  %v1232_v36 = vmul.f32 %v2712_v13, %v2109_v31 }
 0x31f   : > { %v2117_v38 = vpop.eup %2116  ;;  %2132 = vrcp.f32 %v1171_v35  ;;  %1285 = vrot.lane.b32.xlu0 %v2115_v28, %s2229_s22 }
 0x320   : > { %v2119_v55 = vpop.eup %2118  ;;  %2134 = vtanh.f32 %v1232_v36 }
 0x321   : > { %v2717_v61 = vpop.eup %2120  ;;  %v1172_v40 = vadd.f32 1.0, %v2119_v55  ;;  %2136 = vtanh.f32 %v1107_v43 }
 0x322   : > { %v2123_v41 = vpop.eup %2122  ;;  %v1233_v15 = vmul.f32 %v2717_v61, %v2117_v38 }
 0x323   : > { %2138 = vrcp.f32 %v1172_v40  ;;  %1287 = vrot.lane.b32.xlu1 %v2123_v41, %s2229_s22  ;;  %v2125_v21 = vpop.eup %2124 }
 0x324   : > { %2140 = vtanh.f32 %v1233_v15 }
 0x325   : > { %v2721_v26 = vpop.eup %2126 }
 0x326   : > { %v2129_v4 = vpop.eup %2128  ;;  %v1234_v34 = vmul.f32 %v2721_v26, %v2125_v21 }
 0x327   : > { %1289 = vrot.lane.b32.xlu0 %v2129_v4, %s2229_s22  ;;  %v2131_v44 = vpop.eup %2130 }
 0x328   : > { %2142 = vtanh.f32 %v1234_v34 }
 0x329   : > { %v2725_v46 = vpop.eup %2132 }
 0x32a   : > { %v2135_v47 = vpop.eup %2134  ;;  %v1235_v48 = vmul.f32 %v2725_v46, %v2131_v44 }
 0x32b   : > { %1291 = vrot.lane.b32.xlu1 %v2135_v47, %s2229_s22  ;;  %v2137_v49 = vpop.eup %2136 }
 0x32c   : > { %2144 = vtanh.f32 %v1235_v48 }
 0x32d   : > { %v2139_v51 = vpop.eup %2138 }
 0x32e   : > { %v2141_v52 = vpop.eup %2140  ;;  %v1236_v54 = vmul.f32 %v2139_v51, %v2137_v49 }
 0x32f   : > { %1293 = vrot.lane.b32.xlu0 %v2141_v52, %s2229_s22 }
 0x330   : > { %2146 = vtanh.f32 %v1236_v54 }
 0x332   : > { %v2143_v56 = vpop.eup %2142 }
 0x333   : > { %1295 = vrot.lane.b32.xlu1 %v2143_v56, %s2229_s22 }
 0x336   : > { %v2145_v59 = vpop.eup %2144 }
 0x337   : > { %1297 = vrot.lane.b32.xlu0 %v2145_v59, %s2229_s22 }
 0x33a   : > { %v2147_v60 = vpop.eup %2146 }
 0x33b   : > { %1299 = vrot.lane.b32.xlu1 %v2147_v60, %s2229_s22 }
 0x371   : > { %v1270_v62 = vpop.permute.xlu0 %1269 }
 0x372   : > { %v1317_v1 = vmul.f32 %v2651_v39, %v1270_v62 }
 0x375   : > { %v1272_v63 = vpop.permute.xlu1 %1271 }
 0x376   : > { %v1318_v3 = vmul.f32 %v2656_v45, %v1272_v63 }
 0x378   : > { %v1852_v8 = vpack.i.bf16 %v1318_v3, %v1317_v1 }
 0x379   : > { %v1274_v9 = vpop.permute.xlu0 %1273 }
 0x37a   : > { %1853 = vrot.lane.b32.xlu0 %v1852_v8, %s2229_s22  ;;  %v1319_v11 = vmul.f32 %v2661_v57, %v1274_v9 }
 0x37d   : > { %v1276_v10 = vpop.permute.xlu1 %1275 }
 0x37e   : > { %v1320_v12 = vmul.f32 %v2666_v25, %v1276_v10 }
 0x380   : > { %v1857_v14 = vpack.i.bf16 %v1320_v12, %v1319_v11 }
 0x381   : > { %v1278_v16 = vpop.permute.xlu0 %1277 }
 0x382   : > { %1858 = vrot.lane.b32.xlu1 %v1857_v14, %s2229_s22  ;;  %v1321_v19 = vmul.f32 %v2672_v32, %v1278_v16  ;;  %v1333_v16 = vld [vmem:[%s366_s25] sm:$0x1]  ;;  %s2148_s25 = scalar_lea.vmem %s2803_s21, 16 }
 0x383   : > { %p2149_p12 = scmp.ne.s32.totalorder %s2803_s21, %s2148_s25 }
 0x385   : > { %v1280_v18 = vpop.permute.xlu1 %1279  ;;  %p2150_p13 = pnand %p2149_p12, %p2321_p4 }
 0x386   : > { %v1322_v39 = vmul.f32 %v2678_v0, %v1280_v18  ;;  %v1336_v18 = vstv %s1335_s26  ;;  %s2152_s26 = sshll.u32 %s2232_s10, 4  ;;  %s2153_s26 = int_to_ptr.vmem [resolvable:$false] %s2152_s26 }
 0x387   : > { %p2151_p0 = pneg %p2150_p13  ;;  %s2154_s27 = scalar_lea.vmem %s2153_s26, 32 }
 0x388   : > { %v1862_v24 = vpack.i.bf16 %v1322_v39, %v1321_v19  ;;  %p2155_p1 = scmp.lt.s32.totalorder %s2803_s21, %s2153_s26  ;;  %p2156_p2 = scmp.lt.s32.totalorder %s2154_s27, %s2148_s25 }
 0x389   : > { %v1282_v45 = vpop.permute.xlu0 %1281 }
 0x38a   : > { %1863 = vrot.lane.b32.xlu0 %v1862_v24, %s2229_s22  ;;  %v1323_v37 = vmul.f32 %v2684_v6, %v1282_v45  ;;  %p2157_p3 = por %p2156_p2, %p2155_p1 }
 0x38c   : > { %p2158_p5 = pnand %p2157_p3, %p2151_p0 }
 0x38d   : > { %v1284_v7 = vpop.permute.xlu1 %1283 }
 0x38e   : > { %v1324_v57 = vmul.f32 %v2690_v50, %v1284_v7 }
 0x390   : > { %v1867_v17 = vpack.i.bf16 %v1324_v57, %v1323_v37 }
 0x391   : > { %v1286_v25 = vpop.permute.xlu0 %1285 }
 0x392   : > { %1868 = vrot.lane.b32.xlu1 %v1867_v17, %s2229_s22  ;;  %v1325_v58 = vmul.f32 %v2696_v2, %v1286_v25 }
 0x395   : > { %v1288_v22 = vpop.permute.xlu1 %1287 }
 0x396   : > { %v1326_v32 = vmul.f32 %v2702_v20, %v1288_v22 }
 0x398   : > { %v1872_v23 = vpack.i.bf16 %v1326_v32, %v1325_v58 }
 0x399   : > { %v1290_v0 = vpop.permute.xlu0 %1289 }
 0x39a   : > { %1873 = vrot.lane.b32.xlu0 %v1872_v23, %s2229_s22  ;;  %v1327_v29 = vmul.f32 %v2707_v30, %v1290_v0 }
 0x39d   : > { %v1292_v42 = vpop.permute.xlu1 %1291 }
 0x39e   : > { %v1328_v6 = vmul.f32 %v2712_v13, %v1292_v42 }
 0x3a0   : > { %v1877_v53 = vpack.i.bf16 %v1328_v6, %v1327_v29 }
 0x3a1   : > { %v1294_v50 = vpop.permute.xlu0 %1293 }
 0x3a2   : > { %1878 = vrot.lane.b32.xlu1 %v1877_v53, %s2229_s22  ;;  %v1329_v33 = vmul.f32 %v2717_v61, %v1294_v50 }
 0x3a5   : > { %v1296_v31 = vpop.permute.xlu1 %1295 }
 0x3a6   : > { %v1330_v2 = vmul.f32 %v2721_v26, %v1296_v31 }
 0x3a8   : > { %v1882_v35 = vpack.i.bf16 %v1330_v2, %v1329_v33 }
 0x3a9   : > { %v1298_v20 = vpop.permute.xlu0 %1297 }
 0x3aa   : > { %1883 = vrot.lane.b32.xlu0 %v1882_v35, %s2229_s22  ;;  %v1331_v30 = vmul.f32 %v2725_v46, %v1298_v20 }
 0x3ad   : > { %v1300_v28 = vpop.permute.xlu1 %1299 }
 0x3ae   : > { %v1332_v13 = vmul.f32 %v2139_v51, %v1300_v28 }
 0x3b0   : > { %v1887_v36 = vpack.i.bf16 %v1332_v13, %v1331_v30 }
 0x3b2   : > { %1888 = vrot.lane.b32.xlu1 %v1887_v36, %s2229_s22 }
 0x3ec   : > { %v1854_v43 = vpop.permute.xlu0 %1853 }
 0x3ed   : > { %v1856_v38 = vunpack.i.h.bf16 %v1854_v43  ;;  %v1855_v55 = vunpack.i.l.bf16 %v1854_v43 }
 0x3ef   : > { %v1762_v40 = vpack.c.bf16 %v1856_v38, %v1855_v55 }
 0x3f1   : > { %1764 = vmatpush3.bf16.xpose.msk.msra.mxu0 %vm2760_vm3, %v1762_v40 }
 0x3f2   : > { %1765 = vmatprep.subr.bf16.mxu0 %v2230_v27 }
 0x3f4   : > { %v1859_v5 = vpop.permute.xlu1 %1858 }
 0x3f5   : > { %v1861_v41 = vunpack.i.h.bf16 %v1859_v5  ;;  %v1860_v15 = vunpack.i.l.bf16 %v1859_v5 }
 0x3f7   : > { %v1766_v21 = vpack.c.bf16 %v1861_v41, %v1860_v15 }
 0x3f9   : > { %1768 = vmatpush3.bf16.xpose.msk.msra.mxu0 %vm2760_vm3, %v1766_v21 }
 0x3fa   : > { %1769 = vmatprep.subr.bf16.mxu0 %v2230_v27 }
 0x3fc   : > { %v1864_v26 = vpop.permute.xlu0 %1863 }
 0x3fd   : > { %v1866_v4 = vunpack.i.h.bf16 %v1864_v26  ;;  %v1865_v34 = vunpack.i.l.bf16 %v1864_v26 }
 0x3ff   : > { %v1770_v44 = vpack.c.bf16 %v1866_v4, %v1865_v34 }
 0x401   : > { %1772 = vmatpush3.bf16.xpose.msk.msra.mxu0 %vm2760_vm3, %v1770_v44 }
 0x402   : > { %1773 = vmatprep.subr.bf16.mxu0 %v2230_v27 }
 0x404   : > { %v1869_v46 = vpop.permute.xlu1 %1868 }
 0x405   : > { %v1871_v47 = vunpack.i.h.bf16 %v1869_v46  ;;  %v1870_v48 = vunpack.i.l.bf16 %v1869_v46 }
 0x407   : > { %v1774_v49 = vpack.c.bf16 %v1871_v47, %v1870_v48 }
 0x409   : > { %1776 = vmatpush3.bf16.xpose.msk.msra.mxu0 %vm2760_vm3, %v1774_v49 }
 0x40a   : > { %1777 = vmatprep.subr.bf16.mxu0 %v2230_v27 }
 0x40c   : > { %v1874_v51 = vpop.permute.xlu0 %1873 }
 0x40d   : > { %v1876_v52 = vunpack.i.h.bf16 %v1874_v51  ;;  %v1875_v54 = vunpack.i.l.bf16 %v1874_v51 }
 0x40f   : > { %v1778_v56 = vpack.c.bf16 %v1876_v52, %v1875_v54 }
 0x411   : > { %1780 = vmatpush3.bf16.xpose.msk.msra.mxu0 %vm2760_vm3, %v1778_v56 }
 0x412   : > { %1781 = vmatprep.subr.bf16.mxu0 %v2230_v27 }
 0x414   : > { %v1879_v59 = vpop.permute.xlu1 %1878 }
 0x415   : > { %v1881_v60 = vunpack.i.h.bf16 %v1879_v59  ;;  %v1880_v62 = vunpack.i.l.bf16 %v1879_v59 }
 0x417   : > { %v1782_v63 = vpack.c.bf16 %v1881_v60, %v1880_v62 }
 0x419   : > { %1784 = vmatpush3.bf16.xpose.msk.msra.mxu0 %vm2760_vm3, %v1782_v63 }
 0x41a   : > { %1785 = vmatprep.subr.bf16.mxu0 %v2230_v27 }
 0x41c   : > { %v1884_v1 = vpop.permute.xlu0 %1883 }
 0x41d   : > { %v1886_v3 = vunpack.i.h.bf16 %v1884_v1  ;;  %v1885_v8 = vunpack.i.l.bf16 %v1884_v1 }
 0x41f   : > { %v1786_v9 = vpack.c.bf16 %v1886_v3, %v1885_v8 }
 0x421   : > { %1788 = vmatpush3.bf16.xpose.msk.msra.mxu0 %vm2760_vm3, %v1786_v9 }
 0x422   : > { %1789 = vmatprep.subr.bf16.mxu0 %v2230_v27  ;;  %v1334_v27 = vld [vmem:[%s372_s13] sm:$0x1] }
 0x423   : > { %v1337_v19 = vmul.f32 %v1336_v18, %v1334_v27 }
 0x424   : > { %v1889_v10 = vpop.permute.xlu1 %1888 }
 0x425   : > { %v1891_v11 = vunpack.i.h.bf16 %v1889_v10  ;;  %v1890_v12 = vunpack.i.l.bf16 %v1889_v10 }
 0x427   : > { %v1790_v14 = vpack.c.bf16 %v1891_v11, %v1890_v12 }
 0x429   : > { %1792 = vmatpush3.bf16.xpose.msk.msra.mxu0 %vm2760_vm3, %v1790_v14 }
 0x430   : > { %1739 = vmatmul.mubr.msk.f32.vlgmr.msra.gmra.mrb[32].mxu0 %vm915_vm1, %v1333_v16 }
 0x503   : > { %v1487_v39 = vpop.f32.mrb[32].mxu0 }
 0x504   : > { %v1488_v24 = vadd.f32 %v1487_v39, %v1337_v19  ;;  %v1740_v45 = vpop.f32.mrb[33].mxu0 }
 0x506   : > { %1491 = vst [vmem:[%s353_s20] sm:$0x1] %v1488_v24 }
 0x507   : > { %2161 = shalt.err (!%p2158_p5)
}
 0x508   : > { %s2162_s3 = scalar_lea.hbm %s2801_s24, 16  ;;  %s2166_s17 = scalar_lea.hbm %s2856_s8, 32 }
 0x509   : > { %p2163_p6 = scmp.ne.s32.totalorder %s2801_s24, %s2162_s3  ;;  %p2167_p10 = scmp.lt.u32.totalorder %s2801_s24, %s2856_s8 }
 0x50a   : > { %p2168_p11 = scmp.lt.u32.totalorder %s2166_s17, %s2162_s3  ;;  %p2170_p13 = scmp.lt.u32.totalorder %s2162_s3, %s2801_s24 }
 0x50b   : > { %p2164_p7 = pnand %p2163_p6, %p2321_p4 }
 0x50c   : > { %p2169_p12 = por %p2168_p11, %p2167_p10 }
 0x50d   : > { %p2165_p9 = pneg %p2164_p7 }
 0x50e   : > { %p2171_p0 = por %p2170_p13, %p2169_p12 }
 0x510   : > { %p2172_p1 = pnand %p2171_p0, %p2165_p9 }
 0x512   : > { %2175 = shalt.err (!%p2172_p1)
}
 0x513   : > { %1793 = dma.vmem_to_hbm [thread:$0]  (%p2321_p4), %s2803_s21, 16, %s2801_s24, %s1493_s28  }
 0x514 PF: > { %p1799_p2 = scmp.ge.s32.totalorder %s2226_s12, 2  ;;  %s1518_s22 = sand.u32 1, %s2206_s29  }
 0x515   : > { %s1519_s25 = scalar_lea.sflag [#allocation4], %s1518_s22 }
 0x516   : > { %p1796_p3 = pnand %p1799_p2, %p2328_p8 }
 0x518   : > { %2201 = dma.done.wait (!%p1796_p3), %s1519_s25, 16  }
 0x519   : > { %2203 = vsyncadd (!%p1796_p3), %s1519_s25, 4294967280  ;;  %s22_s12 = sadd.s32 1, %s2226_s12   ;;  %s2861_s29 = smov %s2210_s30 }
 0x51a   : > { %p19_p5 = scmp.ge.s32.totalorder %s22_s12, 4   ;;  %s2862_s30 = smov %s2214_s9 }
 0x51b   : > { %s2863_s9 = smov %s2334_s19  ;;  %s2864_s10 = smov %s2222_s11 }
 0x51c   : > { %s2865_s11 = smov %s2867_s14  ;;  %21 = sbr.rel (!%p19_p5) target bundleno = 6 (0x6), region = 93 }
 0x523   :  { %1523 = vsyncpa [#allocation4], 1 }
 0x524   :  { %1525 = vsyncpa [#allocation4 + $0x1], 1 }

</bundles_post_ra>
